<compile_context>
chip_gen: v5e
topology: v5e:2x2
jax: 0.10.0
libtpu: 0.0.40
codegen_flags: <defaults>
</compile_context>

<pallas_src>
import functools

import jax
import jax.numpy as jnp
import numpy as np
from jax import lax
from jax.experimental import pallas as pl
from jax.experimental.pallas import tpu as pltpu

EPS = 1e-5
_QROWS = 8           # query row (1) padded to a full f32 sublane tile
_QPAD_BIAS = -1e9    # bias on padded query rows -> exp(q_pad - max) == 0 exactly
_LANE = 128


def _rup(n, m):
    return ((n + m - 1) // m) * m


def _channel_ln(x, g, b):
    # x: (C, T'); normalize over the channel axis per token; g, b: (C, 1).
    mu = jnp.mean(x, axis=0, keepdims=True)
    var = jnp.mean(jnp.square(x - mu), axis=0, keepdims=True)
    return (x - mu) * lax.rsqrt(var + EPS) * g + b


def linear_attn_ffn_kernel(x_ref, w_ref, b_ref, seg_tp_ref, seg_pt_ref, o_ref,
                           *, C, F, T, BB, w_offs, b_offs, sigmoid_bf16):
    qkv_rows = _QROWS + 2 * C

    # Fold the batch block onto the lane axis: (BB, C, T) -> (C, BB*T).
    if BB == 1:
        x = x_ref[0].astype(jnp.float32)
    else:
        x = jnp.concatenate([x_ref[i] for i in range(BB)], axis=-1).astype(jnp.float32)

    # Static views into the packed parameter slabs (row offsets are 8/16-aligned).
    wqkv = w_ref[w_offs[0]:w_offs[0] + qkv_rows, 0:C]
    wo   = w_ref[w_offs[1]:w_offs[1] + C, 0:C]
    w1   = w_ref[w_offs[2]:w_offs[2] + F, 0:C]
    w2   = w_ref[w_offs[3]:w_offs[3] + C, 0:F]
    sizes = (C, C, qkv_rows, C, C, C, F, C)
    g1, be1, bqkv, bo, g2, be2, bf1, bf2 = [
        b_ref[o:o + n] for o, n in zip(b_offs, sizes)]

    seg_tp = seg_tp_ref[...]          # (BB*T, n_seg_pad) bf16 0/1 selector
    seg_pt = seg_pt_ref[...]          # (n_seg_pad, BB*T)

    # ---------------- pre_norm_attn: LayerNorm -> LinearSelfAttention ----------------
    xn_bf = _channel_ln(x, g1, be1).astype(jnp.bfloat16)

    # Fused q/k/v projection: a single MXU matmul (q sits in row 0 of an 8-row pad).
    qkv = jnp.dot(wqkv, xn_bf, preferred_element_type=jnp.float32) + bqkv      # (8+2C, T')
    q8 = qkv[0:_QROWS]                 # row 0 = q; rows 1..7 ~ -1e9 from the pad bias
    k  = qkv[_QROWS:_QROWS + C]
    v  = qkv[_QROWS + C:qkv_rows]

    # Softmax over patches within each pixel; 1/denom is factored out of the context
    # sum so the divide happens on the tiny (1, n_seg) tile instead of per token.
    m = jnp.max(q8[0:1], axis=1, keepdims=True)        # global stabilizer (exact)
    e8 = jnp.exp(q8 - m)                                # (8, T'); pad rows underflow to 0
    weighted = k * e8[0:1]                              # (C, T')  == k * exp(q - m)
    stacked = jnp.concatenate([e8, weighted], axis=0).astype(jnp.bfloat16)     # (8+C, T')

    red = jnp.dot(stacked, seg_tp, preferred_element_type=jnp.float32)         # (8+C, n_seg_pad)
    inv = pl.reciprocal(red[0:1] + 1e-30, approx=True)  # +eps keeps padded lanes finite
    ctx = (red[_QROWS:_QROWS + C] * inv).astype(jnp.bfloat16)                  # (C, n_seg_pad)
    ctx_t = jnp.dot(ctx, seg_pt, preferred_element_type=jnp.float32)           # (C, T')

    attn = jnp.maximum(v, 0.0) * ctx_t                                         # relu(V) * ctx
    attn = jnp.dot(wo, attn.astype(jnp.bfloat16),
                   preferred_element_type=jnp.float32) + bo                    # (C, T')
    x1 = x + attn                                                              # residual 1

    # ---------------- pre_norm_ffn: LayerNorm -> conv1x1 -> SiLU -> conv1x1 ----------
    y2 = _channel_ln(x1, g2, be2).astype(jnp.bfloat16)
    h = jnp.dot(w1, y2, preferred_element_type=jnp.float32) + bf1              # (F, T')
    if sigmoid_bf16:   # bf16 EUP on v6e/v7x halves the transcendental pushes
        h = h * jax.nn.sigmoid(h.astype(jnp.bfloat16)).astype(jnp.float32)
    else:              # keep f32 sigmoid on v5e (no bf16 EUP) / unknown chips
        h = h * jax.nn.sigmoid(h)
    o = jnp.dot(w2, h.astype(jnp.bfloat16),
                preferred_element_type=jnp.float32) + bf2                      # (C, T')

    out = (x1 + o).astype(o_ref.dtype)                                         # residual 2
    for i in range(BB):
        o_ref[i] = out[:, i * T:(i + 1) * T]


def _pack_params(p, C, F):
    """Pack the 16 parameter tensors into one bf16 weight slab and one f32 column slab."""
    wqkv = np.asarray(p['wqkv'], np.float32)          # (1+2C, C)
    bqkv = np.asarray(p['bqkv'], np.float32)          # (1+2C,)
    qkv_rows = _QROWS + 2 * C
    wqkv_p = np.zeros((qkv_rows, C), np.float32)
    wqkv_p[0] = wqkv[0]
    wqkv_p[_QROWS:] = wqkv[1:]
    bqkv_p = np.full((qkv_rows,), _QPAD_BIAS, np.float32)
    bqkv_p[0] = bqkv[0]
    bqkv_p[_QROWS:] = bqkv[1:]

    # bf16 weight slab; every block starts on a multiple of 16 sublanes.
    cols = max(C, F)
    r1 = _rup(qkv_rows, 16)
    r2 = r1 + _rup(C, 16)
    r3 = r2 + _rup(F, 16)
    w_offs = (0, r1, r2, r3)
    wslab = np.zeros((r3 + _rup(C, 16), cols), np.float32)
    wslab[0:qkv_rows, :C] = wqkv_p
    wslab[r1:r1 + C, :C] = np.asarray(p['wo'], np.float32)
    wslab[r2:r2 + F, :C] = np.asarray(p['w1'], np.float32)
    wslab[r3:r3 + C, :F] = np.asarray(p['w2'], np.float32)

    # f32 (rows, 1) slab for all gamma/beta/bias columns; 8-aligned offsets.
    vecs = [np.asarray(p['g1'], np.float32), np.asarray(p['be1'], np.float32),
            bqkv_p, np.asarray(p['bo'], np.float32),
            np.asarray(p['g2'], np.float32), np.asarray(p['be2'], np.float32),
            np.asarray(p['bf1'], np.float32), np.asarray(p['bf2'], np.float32)]
    b_offs, off = [], 0
    for vv in vecs:
        b_offs.append(off)
        off += _rup(vv.shape[0], 8)
    bslab = np.zeros((off, 1), np.float32)
    for o, vv in zip(b_offs, vecs):
        bslab[o:o + vv.shape[0], 0] = vv

    return (jnp.asarray(wslab, jnp.bfloat16), jnp.asarray(bslab, jnp.float32),
            tuple(w_offs), tuple(b_offs))


def _make_seg(n_seg, seg_len):
    """0/1 segment selector in both orientations (bf16), zero-padded to 128 lanes."""
    cols = _rup(n_seg, _LANE)
    tp = np.zeros((n_seg * seg_len, cols), np.float32)
    for s in range(n_seg):
        tp[s * seg_len:(s + 1) * seg_len, s] = 1.0
    return (jnp.asarray(tp, jnp.bfloat16),
            jnp.asarray(np.ascontiguousarray(tp.T), jnp.bfloat16))


def _tpu_generation():
    try:
        kind = jax.devices()[0].device_kind.lower().replace(" ", "")
    except Exception:
        return "unknown"
    if "v5lite" in kind or "v5e" in kind:
        return "v5e"
    if "v6lite" in kind or "v6e" in kind or "trillium" in kind:
        return "v6e"
    if "v7" in kind:
        return "v7x"
    return "unknown"


def build_linear_attn_ffn(params, *, B, P, N):
    """One-time host-side prep; returns a jitted callable (B, C, P, N) -> (B, C, P, N)."""
    C = params['wo'].shape[0]
    F = params['w1'].shape[0]
    T = P * N

    gen = _tpu_generation()
    # v5e/v6e: single TensorCore -> fold the batch onto lanes, one grid step.
    # v7x/unknown: keep grid=(B,) "parallel" so both v7x TensorCores take one batch each.
    fold_batch = gen in ("v5e", "v6e") and (B * C * T * 4) <= (4 << 20)
    BB = B if fold_batch else 1
    sigmoid_bf16 = gen in ("v6e", "v7x")

    wslab, bslab, w_offs, b_offs = _pack_params(params, C, F)
    seg_tp, seg_pt = _make_seg(BB * P, N)

    kern = functools.partial(
        linear_attn_ffn_kernel, C=C, F=F, T=T, BB=BB,
        w_offs=w_offs, b_offs=b_offs, sigmoid_bf16=sigmoid_bf16)

    full = lambda a: pl.BlockSpec(a.shape, lambda b: (0,) * a.ndim)

    @jax.jit
    def fwd(x_bcpn):
        assert x_bcpn.shape == (B, C, P, N), x_bcpn.shape
        x2 = x_bcpn.reshape(B, C, T)          # flatten (P, N) -> lane-dense token axis
        out = pl.pallas_call(
            kern,
            out_shape=jax.ShapeDtypeStruct((B, C, T), x_bcpn.dtype),
            grid=(B // BB,),
            in_specs=[pl.BlockSpec((BB, C, T), lambda b: (b, 0, 0)),
                      full(wslab), full(bslab), full(seg_tp), full(seg_pt)],
            out_specs=pl.BlockSpec((BB, C, T), lambda b: (b, 0, 0)),
            compiler_params=pltpu.CompilerParams(
                dimension_semantics=("parallel",)),
        )(x2, wslab, bslab, seg_tp, seg_pt)
        return out.reshape(B, C, P, N)

    return fwd


def ref_forward(x, p):
    """Pure-JAX reference following the PyTorch (B, C, P, N) semantics."""
    C = x.shape[1]

    def ln(v, g, b):
        mu = v.mean(axis=1, keepdims=True)
        var = ((v - mu) ** 2).mean(axis=1, keepdims=True)
        return (v - mu) / jnp.sqrt(var + EPS) * g[None, :, None, None] + b[None, :, None, None]

    def conv1x1(v, w, b):
        return jnp.einsum('bcpn,dc->bdpn', v, w) + b[None, :, None, None]

    y = ln(x, p['g1'], p['be1'])
    qkv = conv1x1(y, p['wqkv'], p['bqkv'])
    q, k, v = qkv[:, :1], qkv[:, 1:1 + C], qkv[:, 1 + C:]
    s = jax.nn.softmax(q, axis=-1)
    ctx = jnp.sum(k * s, axis=-1, keepdims=True)
    out = jax.nn.relu(v) * ctx
    x = x + conv1x1(out, p['wo'], p['bo'])
    y2 = ln(x, p['g2'], p['be2'])
    h = conv1x1(y2, p['w1'], p['bf1'])
    h = h * jax.nn.sigmoid(h)
    return x + conv1x1(h, p['w2'], p['bf2'])


def init_params(key, C, F):
    ks = jax.random.split(key, 6)
    return dict(
        g1=jnp.ones((C,), jnp.float32),
        be1=jnp.zeros((C,), jnp.float32),
        wqkv=0.1 * jax.random.normal(ks[0], (1 + 2 * C, C), jnp.float32),
        bqkv=0.01 * jax.random.normal(ks[1], (1 + 2 * C,), jnp.float32),
        wo=0.1 * jax.random.normal(ks[2], (C, C), jnp.float32),
        bo=jnp.zeros((C,), jnp.float32),
        g2=jnp.ones((C,), jnp.float32),
        be2=jnp.zeros((C,), jnp.float32),
        w1=0.1 * jax.random.normal(ks[3], (F, C), jnp.float32),
        bf1=0.01 * jax.random.normal(ks[4], (F,), jnp.float32),
        w2=0.1 * jax.random.normal(ks[5], (C, F), jnp.float32),
        bf2=jnp.zeros((C,), jnp.float32),
    )


if __name__ == "__main__":
    B, C, P, N = 2, 16, 8, 64          # (batch, embed_dim, pixels/patch, num patches)
    FFN = 32                            # ffn_latent_dim; tokens per batch T = P*N = 512

    key = jax.random.PRNGKey(0)
    kx, kp = jax.random.split(key)
    x = jax.random.normal(kx, (B, C, P, N), jnp.float32)
    params = init_params(kp, C, FFN)

    fwd = build_linear_attn_ffn(params, B=B, P=P, N=N)   # one-time host-side layout prep
    out = jax.block_until_ready(fwd(x))
    ref = jax.block_until_ready(ref_forward(x, params))

    assert out.shape == x.shape
    # bf16 MXU operands, bf16 segment reductions, approx reciprocal and (on v6e/v7x)
    # a bf16 sigmoid -> compare against the f32 reference at mixed-precision tolerance.
    np.testing.assert_allclose(np.asarray(out), np.asarray(ref), rtol=2e-2, atol=2e-2)
    print("KERNEL_OK")
</pallas_src>

<mosaic_0001>
module attributes {stable_mosaic.version = 11 : i64} {
  func.func @linear_attn_ffn_kernel(%arg0: i32, %arg1: memref<1x16x512xf32, #tpu.memory_space<vmem>>, %arg2: memref<112x32xbf16, #tpu.memory_space<vmem>>, %arg3: memref<168x1xf32, #tpu.memory_space<vmem>>, %arg4: memref<512x128xbf16, #tpu.memory_space<vmem>>, %arg5: memref<128x512xbf16, #tpu.memory_space<vmem>>, %arg6: memref<1x16x512xf32, #tpu.memory_space<vmem>>) attributes {dimension_semantics = [#tpu.dimension_semantics<parallel>], iteration_bounds = array<i64: 2>, scalar_prefetch = 0 : i64, scratch_operands = 0 : i64, tpu.core_type = #tpu.core_type<tc>, window_params = [{transform_indices = @transform_0, window_bounds = array<i64: 1, 16, 512>}, {pipeline_mode = #tpu.pipeline_mode<synchronous>, transform_indices = @transform_1, window_bounds = array<i64: 112, 32>}, {pipeline_mode = #tpu.pipeline_mode<synchronous>, transform_indices = @transform_2, window_bounds = array<i64: 168, 1>}, {pipeline_mode = #tpu.pipeline_mode<synchronous>, transform_indices = @transform_3, window_bounds = array<i64: 512, 128>}, {pipeline_mode = #tpu.pipeline_mode<synchronous>, transform_indices = @transform_4, window_bounds = array<i64: 128, 512>}, {transform_indices = @transform_5, window_bounds = array<i64: 1, 16, 512>}]} {
    %c0 = arith.constant 0 : index
    %c0_0 = arith.constant 0 : index
    %c0_1 = arith.constant 0 : index
    %0 = vector.load %arg1[%c0, %c0_0, %c0_1] : memref<1x16x512xf32, #tpu.memory_space<vmem>>, vector<1x16x512xf32>
    %1 = vector.shape_cast %0 : vector<1x16x512xf32> to vector<16x512xf32>
    %c0_2 = arith.constant 0 : index
    %c0_3 = arith.constant 0 : index
    %2 = vector.load %arg2[%c0_2, %c0_3] : memref<112x32xbf16, #tpu.memory_space<vmem>>, vector<40x16xbf16>
    %c48 = arith.constant 48 : index
    %c0_4 = arith.constant 0 : index
    %3 = vector.load %arg2[%c48, %c0_4] : memref<112x32xbf16, #tpu.memory_space<vmem>>, vector<16x16xbf16>
    %c64 = arith.constant 64 : index
    %c0_5 = arith.constant 0 : index
    %4 = vector.load %arg2[%c64, %c0_5] : memref<112x32xbf16, #tpu.memory_space<vmem>>, vector<32x16xbf16>
    %c96 = arith.constant 96 : index
    %c0_6 = arith.constant 0 : index
    %5 = vector.load %arg2[%c96, %c0_6] : memref<112x32xbf16, #tpu.memory_space<vmem>>, vector<16x32xbf16>
    %c0_7 = arith.constant 0 : index
    %c0_8 = arith.constant 0 : index
    %6 = vector.load %arg3[%c0_7, %c0_8] : memref<168x1xf32, #tpu.memory_space<vmem>>, vector<16x1xf32>
    %c16 = arith.constant 16 : index
    %c0_9 = arith.constant 0 : index
    %7 = vector.load %arg3[%c16, %c0_9] : memref<168x1xf32, #tpu.memory_space<vmem>>, vector<16x1xf32>
    %c32 = arith.constant 32 : index
    %c0_10 = arith.constant 0 : index
    %8 = vector.load %arg3[%c32, %c0_10] : memref<168x1xf32, #tpu.memory_space<vmem>>, vector<40x1xf32>
    %c72 = arith.constant 72 : index
    %c0_11 = arith.constant 0 : index
    %9 = vector.load %arg3[%c72, %c0_11] : memref<168x1xf32, #tpu.memory_space<vmem>>, vector<16x1xf32>
    %c88 = arith.constant 88 : index
    %c0_12 = arith.constant 0 : index
    %10 = vector.load %arg3[%c88, %c0_12] : memref<168x1xf32, #tpu.memory_space<vmem>>, vector<16x1xf32>
    %c104 = arith.constant 104 : index
    %c0_13 = arith.constant 0 : index
    %11 = vector.load %arg3[%c104, %c0_13] : memref<168x1xf32, #tpu.memory_space<vmem>>, vector<16x1xf32>
    %c120 = arith.constant 120 : index
    %c0_14 = arith.constant 0 : index
    %12 = vector.load %arg3[%c120, %c0_14] : memref<168x1xf32, #tpu.memory_space<vmem>>, vector<32x1xf32>
    %c152 = arith.constant 152 : index
    %c0_15 = arith.constant 0 : index
    %13 = vector.load %arg3[%c152, %c0_15] : memref<168x1xf32, #tpu.memory_space<vmem>>, vector<16x1xf32>
    %c0_16 = arith.constant 0 : index
    %c0_17 = arith.constant 0 : index
    %14 = vector.load %arg4[%c0_16, %c0_17] : memref<512x128xbf16, #tpu.memory_space<vmem>>, vector<512x128xbf16>
    %c0_18 = arith.constant 0 : index
    %c0_19 = arith.constant 0 : index
    %15 = vector.load %arg5[%c0_18, %c0_19] : memref<128x512xbf16, #tpu.memory_space<vmem>>, vector<128x512xbf16>
    %cst = arith.constant dense<0.000000e+00> : vector<512xf32>
    %16 = vector.multi_reduction <add>, %1, %cst [0] : vector<16x512xf32> to vector<512xf32>
    %17 = vector.shape_cast %16 : vector<512xf32> to vector<1x512xf32>
    %cst_20 = arith.constant 1.600000e+01 : f32
    %18 = vector.broadcast %cst_20 : f32 to vector<1x512xf32>
    %19 = arith.divf %17, %18 : vector<1x512xf32>
    %20 = vector.broadcast %19 : vector<1x512xf32> to vector<16x512xf32>
    %21 = arith.subf %1, %20 : vector<16x512xf32>
    %22 = arith.mulf %21, %21 : vector<16x512xf32>
    %cst_21 = arith.constant dense<0.000000e+00> : vector<512xf32>
    %23 = vector.multi_reduction <add>, %22, %cst_21 [0] : vector<16x512xf32> to vector<512xf32>
    %24 = vector.shape_cast %23 : vector<512xf32> to vector<1x512xf32>
    %cst_22 = arith.constant 1.600000e+01 : f32
    %25 = vector.broadcast %cst_22 : f32 to vector<1x512xf32>
    %26 = arith.divf %24, %25 : vector<1x512xf32>
    %27 = vector.broadcast %19 : vector<1x512xf32> to vector<16x512xf32>
    %28 = arith.subf %1, %27 : vector<16x512xf32>
    %cst_23 = arith.constant 9.99999974E-6 : f32
    %29 = vector.broadcast %cst_23 : f32 to vector<1x512xf32>
    %30 = arith.addf %26, %29 : vector<1x512xf32>
    %31 = math.rsqrt %30 : vector<1x512xf32>
    %32 = vector.broadcast %31 : vector<1x512xf32> to vector<16x512xf32>
    %33 = arith.mulf %28, %32 : vector<16x512xf32>
    %34 = vector.broadcast %6 : vector<16x1xf32> to vector<16x512xf32>
    %35 = arith.mulf %33, %34 : vector<16x512xf32>
    %36 = vector.broadcast %7 : vector<16x1xf32> to vector<16x512xf32>
    %37 = arith.addf %35, %36 : vector<16x512xf32>
    %38 = arith.truncf %37 : vector<16x512xf32> to vector<16x512xbf16>
    %cst_24 = arith.constant dense<0.000000e+00> : vector<40x512xf32>
    %39 = tpu.matmul %2, %38, %cst_24 {dimension_numbers = #tpu.dot_dimension_numbers<[1], [0], [0], [1], [0, 0, 1, 1], [], []>} : vector<40x16xbf16>, vector<16x512xbf16>, vector<40x512xf32> -> vector<40x512xf32>
    %40 = vector.broadcast %8 : vector<40x1xf32> to vector<40x512xf32>
    %41 = arith.addf %39, %40 : vector<40x512xf32>
    %42 = vector.extract_strided_slice %41 {offsets = [0, 0], sizes = [8, 512], strides = [1, 1]} : vector<40x512xf32> to vector<8x512xf32>
    %43 = vector.extract_strided_slice %41 {offsets = [8, 0], sizes = [16, 512], strides = [1, 1]} : vector<40x512xf32> to vector<16x512xf32>
    %44 = vector.extract_strided_slice %41 {offsets = [24, 0], sizes = [16, 512], strides = [1, 1]} : vector<40x512xf32> to vector<16x512xf32>
    %45 = vector.extract_strided_slice %42 {offsets = [0, 0], sizes = [1, 512], strides = [1, 1]} : vector<8x512xf32> to vector<1x512xf32>
    %cst_25 = arith.constant dense<0xFF800000> : vector<1xf32>
    %46 = vector.multi_reduction <maximumf>, %45, %cst_25 [1] : vector<1x512xf32> to vector<1xf32>
    %47 = vector.shape_cast %46 : vector<1xf32> to vector<1x1xf32>
    %48 = vector.broadcast %47 : vector<1x1xf32> to vector<8x512xf32>
    %49 = arith.subf %42, %48 : vector<8x512xf32>
    %50 = math.exp %49 : vector<8x512xf32>
    %51 = vector.extract_strided_slice %50 {offsets = [0, 0], sizes = [1, 512], strides = [1, 1]} : vector<8x512xf32> to vector<1x512xf32>
    %52 = vector.broadcast %51 : vector<1x512xf32> to vector<16x512xf32>
    %53 = arith.mulf %43, %52 : vector<16x512xf32>
    %54 = tpu.concatenate %50, %53 in 0 : vector<8x512xf32>, vector<16x512xf32> -> vector<24x512xf32>
    %55 = arith.truncf %54 : vector<24x512xf32> to vector<24x512xbf16>
    %cst_26 = arith.constant dense<0.000000e+00> : vector<24x128xf32>
    %56 = tpu.matmul %55, %14, %cst_26 {dimension_numbers = #tpu.dot_dimension_numbers<[1], [0], [0], [1], [0, 0, 1, 1], [], []>} : vector<24x512xbf16>, vector<512x128xbf16>, vector<24x128xf32> -> vector<24x128xf32>
    %57 = vector.extract_strided_slice %56 {offsets = [0, 0], sizes = [1, 128], strides = [1, 1]} : vector<24x128xf32> to vector<1x128xf32>
    %cst_27 = arith.constant 1.000000e-30 : f32
    %58 = vector.broadcast %cst_27 : f32 to vector<1x128xf32>
    %59 = arith.addf %57, %58 : vector<1x128xf32>
    %60 = tpu.reciprocal %59 {approx = true} : vector<1x128xf32> -> vector<1x128xf32>
    %61 = vector.extract_strided_slice %56 {offsets = [8, 0], sizes = [16, 128], strides = [1, 1]} : vector<24x128xf32> to vector<16x128xf32>
    %62 = vector.broadcast %60 : vector<1x128xf32> to vector<16x128xf32>
    %63 = arith.mulf %61, %62 : vector<16x128xf32>
    %64 = arith.truncf %63 : vector<16x128xf32> to vector<16x128xbf16>
    %cst_28 = arith.constant dense<0.000000e+00> : vector<16x512xf32>
    %65 = tpu.matmul %64, %15, %cst_28 {dimension_numbers = #tpu.dot_dimension_numbers<[1], [0], [0], [1], [0, 0, 1, 1], [], []>} : vector<16x128xbf16>, vector<128x512xbf16>, vector<16x512xf32> -> vector<16x512xf32>
    %cst_29 = arith.constant 0.000000e+00 : f32
    %66 = vector.broadcast %cst_29 : f32 to vector<16x512xf32>
    %67 = arith.maximumf %44, %66 : vector<16x512xf32>
    %68 = arith.mulf %67, %65 : vector<16x512xf32>
    %69 = arith.truncf %68 : vector<16x512xf32> to vector<16x512xbf16>
    %cst_30 = arith.constant dense<0.000000e+00> : vector<16x512xf32>
    %70 = tpu.matmul %3, %69, %cst_30 {dimension_numbers = #tpu.dot_dimension_numbers<[1], [0], [0], [1], [0, 0, 1, 1], [], []>} : vector<16x16xbf16>, vector<16x512xbf16>, vector<16x512xf32> -> vector<16x512xf32>
    %71 = vector.broadcast %9 : vector<16x1xf32> to vector<16x512xf32>
    %72 = arith.addf %70, %71 : vector<16x512xf32>
    %73 = arith.addf %1, %72 : vector<16x512xf32>
    %cst_31 = arith.constant dense<0.000000e+00> : vector<512xf32>
    %74 = vector.multi_reduction <add>, %73, %cst_31 [0] : vector<16x512xf32> to vector<512xf32>
    %75 = vector.shape_cast %74 : vector<512xf32> to vector<1x512xf32>
    %cst_32 = arith.constant 1.600000e+01 : f32
    %76 = vector.broadcast %cst_32 : f32 to vector<1x512xf32>
    %77 = arith.divf %75, %76 : vector<1x512xf32>
    %78 = vector.broadcast %77 : vector<1x512xf32> to vector<16x512xf32>
    %79 = arith.subf %73, %78 : vector<16x512xf32>
    %80 = arith.mulf %79, %79 : vector<16x512xf32>
    %cst_33 = arith.constant dense<0.000000e+00> : vector<512xf32>
    %81 = vector.multi_reduction <add>, %80, %cst_33 [0] : vector<16x512xf32> to vector<512xf32>
    %82 = vector.shape_cast %81 : vector<512xf32> to vector<1x512xf32>
    %cst_34 = arith.constant 1.600000e+01 : f32
    %83 = vector.broadcast %cst_34 : f32 to vector<1x512xf32>
    %84 = arith.divf %82, %83 : vector<1x512xf32>
    %85 = vector.broadcast %77 : vector<1x512xf32> to vector<16x512xf32>
    %86 = arith.subf %73, %85 : vector<16x512xf32>
    %cst_35 = arith.constant 9.99999974E-6 : f32
    %87 = vector.broadcast %cst_35 : f32 to vector<1x512xf32>
    %88 = arith.addf %84, %87 : vector<1x512xf32>
    %89 = math.rsqrt %88 : vector<1x512xf32>
    %90 = vector.broadcast %89 : vector<1x512xf32> to vector<16x512xf32>
    %91 = arith.mulf %86, %90 : vector<16x512xf32>
    %92 = vector.broadcast %10 : vector<16x1xf32> to vector<16x512xf32>
    %93 = arith.mulf %91, %92 : vector<16x512xf32>
    %94 = vector.broadcast %11 : vector<16x1xf32> to vector<16x512xf32>
    %95 = arith.addf %93, %94 : vector<16x512xf32>
    %96 = arith.truncf %95 : vector<16x512xf32> to vector<16x512xbf16>
    %cst_36 = arith.constant dense<0.000000e+00> : vector<32x512xf32>
    %97 = tpu.matmul %4, %96, %cst_36 {dimension_numbers = #tpu.dot_dimension_numbers<[1], [0], [0], [1], [0, 0, 1, 1], [], []>} : vector<32x16xbf16>, vector<16x512xbf16>, vector<32x512xf32> -> vector<32x512xf32>
    %98 = vector.broadcast %12 : vector<32x1xf32> to vector<32x512xf32>
    %99 = arith.addf %97, %98 : vector<32x512xf32>
    %100 = arith.negf %99 : vector<32x512xf32>
    %101 = math.exp %100 : vector<32x512xf32>
    %cst_37 = arith.constant 1.000000e+00 : f32
    %102 = vector.broadcast %cst_37 : f32 to vector<32x512xf32>
    %103 = arith.addf %102, %101 : vector<32x512xf32>
    %104 = arith.divf %102, %103 : vector<32x512xf32>
    %105 = arith.mulf %99, %104 : vector<32x512xf32>
    %106 = arith.truncf %105 : vector<32x512xf32> to vector<32x512xbf16>
    %cst_38 = arith.constant dense<0.000000e+00> : vector<16x512xf32>
    %107 = tpu.matmul %5, %106, %cst_38 {dimension_numbers = #tpu.dot_dimension_numbers<[1], [0], [0], [1], [0, 0, 1, 1], [], []>} : vector<16x32xbf16>, vector<32x512xbf16>, vector<16x512xf32> -> vector<16x512xf32>
    %108 = vector.broadcast %13 : vector<16x1xf32> to vector<16x512xf32>
    %109 = arith.addf %107, %108 : vector<16x512xf32>
    %110 = arith.addf %73, %109 : vector<16x512xf32>
    %c0_39 = arith.constant 0 : index
    %c0_40 = arith.constant 0 : index
    %c0_41 = arith.constant 0 : index
    %111 = vector.load %arg6[%c0_39, %c0_40, %c0_41] : memref<1x16x512xf32, #tpu.memory_space<vmem>>, vector<1x16x512xf32>
    %112 = vector.shape_cast %111 : vector<1x16x512xf32> to vector<16x512xf32>
    %113 = vector.shape_cast %110 : vector<16x512xf32> to vector<1x16x512xf32>
    tpu.vector_store %arg6[%c0_39, %c0_40, %c0_41], %113 {strides = array<i32>} : memref<1x16x512xf32, #tpu.memory_space<vmem>>, vector<1x16x512xf32>,
    return
  }
  func.func @transform_0(%arg0: i32) -> (i32, i32, i32) {
    %c0_i32 = arith.constant 0 : i32
    %c0_i32_0 = arith.constant 0 : i32
    %c0_i32_1 = arith.constant 0 : i32
    return %arg0, %c0_i32, %c0_i32_0 : i32, i32, i32
  }
  func.func @transform_1(%arg0: i32) -> (i32, i32) {
    %c0_i32 = arith.constant 0 : i32
    %c0_i32_0 = arith.constant 0 : i32
    %c0_i32_1 = arith.constant 0 : i32
    return %c0_i32, %c0_i32_0 : i32, i32
  }
  func.func @transform_2(%arg0: i32) -> (i32, i32) {
    %c0_i32 = arith.constant 0 : i32
    %c0_i32_0 = arith.constant 0 : i32
    %c0_i32_1 = arith.constant 0 : i32
    return %c0_i32, %c0_i32_0 : i32, i32
  }
  func.func @transform_3(%arg0: i32) -> (i32, i32) {
    %c0_i32 = arith.constant 0 : i32
    %c0_i32_0 = arith.constant 0 : i32
    %c0_i32_1 = arith.constant 0 : i32
    return %c0_i32, %c0_i32_0 : i32, i32
  }
  func.func @transform_4(%arg0: i32) -> (i32, i32) {
    %c0_i32 = arith.constant 0 : i32
    %c0_i32_0 = arith.constant 0 : i32
    %c0_i32_1 = arith.constant 0 : i32
    return %c0_i32, %c0_i32_0 : i32, i32
  }
  func.func @transform_5(%arg0: i32) -> (i32, i32, i32) {
    %c0_i32 = arith.constant 0 : i32
    %c0_i32_0 = arith.constant 0 : i32
    %c0_i32_1 = arith.constant 0 : i32
    return %arg0, %c0_i32, %c0_i32_0 : i32, i32, i32
  }
}

</mosaic_0001>

<bundles_post_ra>
// kernel: fwd.1
= control target key start
LH: loop header
LB: loop body
LE: loop exit
PB: predicated region body
PF: predicated region fallthrough
CT: control target
= control target key end

     0   :  { %10 = vsyncpa [#allocation3], 0  ;;  %s3813_s0 = inlined_call_operand.vmem [shape: f32[2,16,512], index: 0, kind: input, shape index: {}]   ;;  %s3814_s1 = inlined_call_operand.vmem [shape: bf16[112,32], index: 1, kind: input, shape index: {}]   ;;  %s3815_s2 = inlined_call_operand.hbm [shape: f32[168,1], index: 2, kind: input, shape index: {}]   ;;  %s3816_s3 = inlined_call_operand.hbm [shape: bf16[512,128], index: 3, kind: input, shape index: {}]   ;;  %s3817_s4 = inlined_call_operand.vmem [shape: bf16[128,512], index: 4, kind: input, shape index: {}]   ;;  %s3818_s5 = inlined_call_operand.vmem [shape: f32[2,16,512], index: 5, kind: output, shape index: {}]  }
   0x1   :  { %11 = vsyncpa [#allocation5], 0  ;;  %s2791_s18 = smov 0  }
   0x2 LB: > { %s172_s21 = sshll.u32 %s3815_s2, 4  ;;  %s2800_s22 = sadd.s32 4294967295, %s2751_s18   ;;  %s2751_s18 = sphi %s2791_s18, %s17_s18   ;;  %s173_s21 = int_to_ptr.hbm [resolvable:$true] %s172_s21 }
   0x3   : > { %p2130_p0 = scmp.ge.s32.totalorder %s2751_s18, 1  ;;  %p158_p1 = scmp.lt.s32.totalorder %s2751_s18, 3 }
   0x4   : > { %p2554_p2 = scmp.eq.s32.totalorder %s2800_s22, 0  ;;  %s2753_s24 = smov [#allocation2]  }
   0x5   : > { %p2805_p3 = pnand %p2130_p0, %p158_p1  ;;  %s174_s25 = sshll.u32 %s2753_s24, 4  ;;  %s175_s25 = int_to_ptr.vmem [resolvable:$true] %s174_s25 }
   0x6   : > { %s186_s28 = sshll.u32 %s3816_s3, 4  ;;  %s2754_s29 = smov [#allocation4]   ;;  %s187_s28 = int_to_ptr.hbm [resolvable:$true] %s186_s28 }
   0x7   : > { %p2547_p4 = pneg %p2805_p3  ;;  %s188_s30 = sshll.u32 %s2754_s29, 4  ;;  %s189_s30 = int_to_ptr.vmem [resolvable:$true] %s188_s30 }
   0x8   : > { %s2755_s6 = smov 128   ;;  %s2756_s7 = smov 8  }
   0x9   : > { %p2548_p5 = pnand %p2554_p2, %p2547_p4  ;;  %s2757_s8 = smov 64  }
   0xa   : > { %s2758_s9 = smov 4   ;;  %215 = sbr.rel (%p2805_p3) target bundleno = 1300 (0x514), region = 40 }
   0xb   : > { %2550 = dma.hbm_to_vmem [thread:$0]  (!%p2548_p5), %s173_s21, 2688, %s175_s25, [#allocation3], %s2755_s6, %s2755_s6, %s2756_s7  }
   0xc   : > { %2553 = dma.hbm_to_vmem [thread:$0]  (!%p2548_p5), %s187_s28, 4096, %s189_s30, [#allocation5], %s2757_s8, %s2757_s8, %s2758_s9  }
   0xf   : > { %2742 = dma.done.wait (%p2554_p2), [#allocation3], 2688  }
  0x10   : > { %2744 = vsyncadd (%p2554_p2), [#allocation3], 4294964608 }
  0x11   : > { %2746 = dma.done.wait (%p2554_p2), [#allocation5], 4096  }
  0x12   : > { %2748 = vsyncadd (%p2554_p2), [#allocation5], 4294963200  ;;  %v2759_v0 = vmov 0   ;;  %v283_v1 = vld [vmem:[#allocation2 + $0x10] sm:$0xff]  ;;  %v281_v2 = vld [vmem:[#allocation2] sm:$0xff]  ;;  %p249_p6 = scmp.lt.s32.totalorder %s2800_s22, 1 }
  0x13   : > { %2575 = vset.pattern.permute.xlu1 %v2759_v0  ;;  %2574 = vset.pattern.permute.xlu0 %v2759_v0  ;;  %v284_v3 = vld [vmem:[#allocation2 + $0x18] sm:$0xff]  ;;  %v282_v4 = vld [vmem:[#allocation2 + $0x8] sm:$0xff]  ;;  %v287_v5 = vld [vmem:[#allocation2 + $0x30] sm:$0xff]  ;;  %v2760_v9 = vmov 16.0   ;;  %vm615_vm13 = vcmask 130048   ;;  %vm717_vm14 = vcmask 1040384  }
  0x14   : > { %2576 = vset.pattern.permute.xlu2 %v2759_v0  ;;  %557 = vperm.xlu1 %2575, %v283_v1   ;;  %v286_v6 = vld [vmem:[#allocation2 + $0x28] sm:$0xff]  ;;  %s3866_s22 = smov (!%p249_p6, %s2800_s22), 1  ;;  %v289_v7 = vld [vmem:[#allocation2 + $0x40] sm:$0xff]  ;;  %v288_v8 = vld [vmem:[#allocation2 + $0x38] sm:$0xff]  ;;  %2577 = vrcp.f32 %v2760_v9 }
  0x15   : > { %539 = vperm.xlu0 %2574, %v281_v2   ;;  %s2467_s10 = sshll.u32 %s3866_s22, 6  ;;  %v291_v25 = vld [vmem:[#allocation2 + $0x50] sm:$0xff]  ;;  %v290_v26 = vld [vmem:[#allocation2 + $0x48] sm:$0xff]  ;;  %v293_v47 = vld [vmem:[#allocation2 + $0x60] sm:$0xff] }
  0x16   : > { %s2836_s13 = scalar_lea.vmem %s3813_s0, %s2467_s10  ;;  %v292_v48 = vld [vmem:[#allocation2 + $0x58] sm:$0xff]  ;;  %v294_v9 = vld [vmem:[#allocation2 + $0x68] sm:$0xff]  ;;  %s3792_s8 = scalar_lea.vmem %s3818_s5, %s2467_s10 }
  0x17   : > { %v260_v10 = vld [vmem:[%s2836_s13] sm:$0xff]  ;;  %v261_v13 = vld [vmem:[%s2836_s13 + $0x8] sm:$0xff]  ;;  %v262_v15 = vld [vmem:[%s2836_s13 + $0x10] sm:$0xff] }
  0x18   : > { %v264_v11 = vld [vmem:[%s2836_s13 + $0x20] sm:$0xff]  ;;  %v265_v14 = vld [vmem:[%s2836_s13 + $0x28] sm:$0xff]  ;;  %v266_v17 = vld [vmem:[%s2836_s13 + $0x30] sm:$0xff] }
  0x19   : > { %v398_v12 = vadd.f32 %v264_v11, %v260_v10  ;;  %v405_v16 = vadd.f32 %v265_v14, %v261_v13  ;;  %v263_v18 = vld [vmem:[%s2836_s13 + $0x18] sm:$0xff]  ;;  %v412_v21 = vadd.f32 %v266_v17, %v262_v15 }
  0x1a   : > { %v267_v19 = vld [vmem:[%s2836_s13 + $0x38] sm:$0xff]  ;;  %v2578_v24 = vpop.eup %2577 }
  0x1b   : > { %v399_v20 = vrot.slane %v398_v12, 4  ;;  %v419_v22 = vadd.f32 %v267_v19, %v263_v18  ;;  %v406_v23 = vrot.slane %v405_v16, 4  ;;  %v413_v28 = vrot.slane %v412_v21, 4 }
  0x1c   : > { %562 = vperm.xlu1 %2575, %v284_v3   ;;  %v427_v30 = vmul.f32 16.0, %v2578_v24  ;;  %vm431_vm0 = vweird.f32 %v2578_v24 }
  0x1d   : > { %544 = vperm.xlu0 %2574, %v282_v4   ;;  %v400_v27 = vadd.f32 %v399_v20, %v398_v12  ;;  %v420_v29 = vrot.slane %v419_v22, 4  ;;  %v407_v31 = vadd.f32 %v406_v23, %v405_v16  ;;  %v414_v33 = vadd.f32 %v413_v28, %v412_v21  ;;  %v299_v23 = vld [vmem:[#allocation2 + $0x90] sm:$0xff] }
  0x1e   : > { %v428_v35 = vsub.f32 1.0, %v427_v30 }
  0x1f   : > { %v401_v32 = vrot.slane %v400_v27, 2  ;;  %v421_v34 = vadd.f32 %v420_v29, %v419_v22  ;;  %v408_v36 = vrot.slane %v407_v31, 2  ;;  %v415_v38 = vrot.slane %v414_v33, 2  ;;  %v296_v22 = vld [vmem:[#allocation2 + $0x78] sm:$0xff] }
  0x20   : > { %v429_v40 = vmul.f32 %v2578_v24, %v428_v35 }
  0x21   : > { %v402_v37 = vadd.f32 %v401_v32, %v400_v27  ;;  %v422_v39 = vrot.slane %v421_v34, 2  ;;  %v409_v41 = vadd.f32 %v408_v36, %v407_v31  ;;  %v416_v43 = vadd.f32 %v415_v38, %v414_v33  ;;  %v300_v32 = vld [vmem:[#allocation2 + $0x98] sm:$0xff]  ;;  %v297_v33 = vld [vmem:[#allocation2 + $0x80] sm:$0xff] }
  0x22   : > { %v430_v45 = vadd.f32 %v2578_v24, %v429_v40 }
  0x23   : > { %v403_v42 = vrot.slane %v402_v37, 1  ;;  %v423_v44 = vadd.f32 %v422_v39, %v421_v34  ;;  %v410_v46 = vrot.slane %v409_v41, 1  ;;  %v417_v50 = vrot.slane %v416_v43, 1 }
  0x24   : > { %589 = vperm.xlu1 %2575, %v287_v5   ;;  %v2846_v52 = vsel %vm431_vm0, %v2578_v24, %v430_v45 }
  0x25   : > { %584 = vperm.xlu0 %2574, %v286_v6   ;;  %v404_v49 = vadd.f32 %v403_v42, %v402_v37  ;;  %v424_v51 = vrot.slane %v423_v44, 1  ;;  %v411_v53 = vadd.f32 %v410_v46, %v409_v41  ;;  %v418_v55 = vadd.f32 %v417_v50, %v416_v43  ;;  %v301_v42 = vld [vmem:[#allocation2 + $0xa0] sm:$0xff] }
  0x27   : > { %v433_v54 = vmul.f32 %v2846_v52, %v404_v49  ;;  %v425_v56 = vadd.f32 %v424_v51, %v423_v44  ;;  %v434_v57 = vmul.f32 %v2846_v52, %v411_v53  ;;  %v435_v60 = vmul.f32 %v2846_v52, %v418_v55 }
  0x29   : > { %v2850_v58 = vsub.f32 %v260_v10, %v433_v54  ;;  %v2852_v59 = vsub.f32 %v264_v11, %v433_v54  ;;  %v436_v61 = vmul.f32 %v2846_v52, %v425_v56  ;;  %v2856_v62 = vsub.f32 %v261_v13, %v434_v57 }
  0x2a   : > { %v2858_v63 = vsub.f32 %v265_v14, %v434_v57  ;;  %v2864_v2 = vsub.f32 %v262_v15, %v435_v60  ;;  %v2866_v3 = vsub.f32 %v266_v17, %v435_v60 }
  0x2b   : > { %v445_v0 = vmul.f32 %v2850_v58, %v2850_v58  ;;  %v449_v1 = vmul.f32 %v2852_v59, %v2852_v59  ;;  %v446_v4 = vmul.f32 %v2856_v62, %v2856_v62  ;;  %v2872_v6 = vsub.f32 %v263_v18, %v436_v61 }
  0x2c   : > { %599 = vperm.xlu1 %2575, %v289_v7   ;;  %v450_v5 = vmul.f32 %v2858_v63, %v2858_v63  ;;  %v2874_v7 = vsub.f32 %v267_v19, %v436_v61  ;;  %v447_v11 = vmul.f32 %v2864_v2, %v2864_v2  ;;  %v451_v12 = vmul.f32 %v2866_v3, %v2866_v3 }
  0x2d   : > { %594 = vperm.xlu0 %2574, %v288_v8   ;;  %v295_v8 = vld [vmem:[#allocation2 + $0x70] sm:$0xff]  ;;  %v453_v10 = vadd.f32 %v449_v1, %v445_v0  ;;  %v448_v14 = vmul.f32 %v2872_v6, %v2872_v6 }
  0x2e   : > { %v460_v13 = vadd.f32 %v450_v5, %v446_v4  ;;  %v452_v15 = vmul.f32 %v2874_v7, %v2874_v7  ;;  %v467_v16 = vadd.f32 %v451_v12, %v447_v11 }
  0x2f   : > { %v454_v18 = vrot.slane %v453_v10, 4 }
  0x30   : > { %v474_v17 = vadd.f32 %v452_v15, %v448_v14  ;;  %v461_v19 = vrot.slane %v460_v13, 4  ;;  %v468_v20 = vrot.slane %v467_v16, 4 }
  0x31   : > { %v455_v24 = vadd.f32 %v454_v18, %v453_v10 }
  0x32   : > { %v475_v21 = vrot.slane %v474_v17, 4 }
  0x33   : > { %v456_v28 = vrot.slane %v455_v24, 2 }
  0x34   : > { %1273 = vperm.xlu1 %2575, %v291_v25   ;;  %v462_v25 = vadd.f32 %v461_v19, %v460_v13  ;;  %v476_v27 = vadd.f32 %v475_v21, %v474_v17 }
  0x35   : > { %1268 = vperm.xlu0 %2574, %v290_v26   ;;  %v469_v26 = vadd.f32 %v468_v20, %v467_v16  ;;  %v457_v34 = vadd.f32 %v456_v28, %v455_v24 }
  0x36   : > { %v463_v29 = vrot.slane %v462_v25, 2  ;;  %v477_v31 = vrot.slane %v476_v27, 2 }
  0x37   : > { %v470_v30 = vrot.slane %v469_v26, 2  ;;  %v458_v38 = vrot.slane %v457_v34, 1 }
  0x38   : > { %v464_v35 = vadd.f32 %v463_v29, %v462_v25  ;;  %v478_v37 = vadd.f32 %v477_v31, %v476_v27 }
  0x39   : > { %v471_v36 = vadd.f32 %v470_v30, %v469_v26  ;;  %v459_v43 = vadd.f32 %v458_v38, %v457_v34 }
  0x3a   : > { %v465_v39 = vrot.slane %v464_v35, 1  ;;  %v479_v41 = vrot.slane %v478_v37, 1 }
  0x3b   : > { %v472_v40 = vrot.slane %v471_v36, 1 }
  0x3c   : > { %1487 = vperm.xlu1 %2575, %v293_v47   ;;  %v466_v44 = vadd.f32 %v465_v39, %v464_v35  ;;  %v480_v46 = vadd.f32 %v479_v41, %v478_v37  ;;  %v481_v47 = vmul.f32 %v459_v43, %v2846_v52 }
  0x3d   : > { %1482 = vperm.xlu0 %2574, %v292_v48   ;;  %v473_v45 = vadd.f32 %v472_v40, %v471_v36 }
  0x3e   : > { %v482_v48 = vmul.f32 %v466_v44, %v2846_v52  ;;  %v484_v50 = vmul.f32 %v480_v46, %v2846_v52  ;;  %v485_v51 = vadd.f32 1e-05, %v481_v47 }
  0x3f   : > { %v483_v49 = vmul.f32 %v473_v45, %v2846_v52 }
  0x40   : > { %v486_v53 = vadd.f32 1e-05, %v482_v48  ;;  %v488_v55 = vadd.f32 1e-05, %v484_v50  ;;  %2579 = vrsqrt.f32 %v485_v51  ;;  %vm495_vm1 = vweird.f32 %v485_v51 }
  0x41   : > { %v487_v54 = vadd.f32 1e-05, %v483_v49 }
  0x42   : > { %2581 = vrsqrt.f32 %v486_v53  ;;  %vm505_vm3 = vweird.f32 %v486_v53  ;;  %vm525_vm8 = vweird.f32 %v488_v55 }
  0x43   : > { %2583 = vrsqrt.f32 %v487_v54  ;;  %vm515_vm5 = vweird.f32 %v487_v54 }
  0x44   : > { %1505 = vperm.xlu1 %2575, %v295_v8   ;;  %2585 = vrsqrt.f32 %v488_v55 }
  0x45   : > { %1500 = vperm.xlu0 %2574, %v294_v9  }
  0x46   : > { %v2580_v56 = vpop.eup %2579 }
  0x47   : > { %v490_v0 = vmul.f32 %v2580_v56, %v485_v51  ;;  %vm496_vm2 = vweird.f32 %v2580_v56 }
  0x48   : > { %v2582_v57 = vpop.eup %2581  ;;  %vm497_vm7 = vmor %vm495_vm1, %vm496_vm2 }
  0x49   : > { %v2584_v60 = vpop.eup %2583  ;;  %v500_v1 = vmul.f32 %v2582_v57, %v486_v53  ;;  %v491_v8 = vmul.f32 %v2580_v56, %v490_v0  ;;  %vm506_vm4 = vweird.f32 %v2582_v57  ;;  %v2469_v53 = vld [vmem:[%s3814_s1] sm:$0xff] }
  0x4a   : > { %v2586_v61 = vpop.eup %2585  ;;  %v510_v4 = vmul.f32 %v2584_v60, %v487_v54  ;;  %vm516_vm6 = vweird.f32 %v2584_v60  ;;  %vm507_vm10 = vmor %vm505_vm3, %vm506_vm4  ;;  %v285_v54 = vld [vmem:[#allocation2 + $0x20] sm:$0xff] }
  0x4b   : > { %v520_v5 = vmul.f32 %v2586_v61, %v488_v55  ;;  %v501_v9 = vmul.f32 %v2582_v57, %v500_v1  ;;  %v492_v12 = vmul.f32 0.5, %v491_v8  ;;  %vm526_vm9 = vweird.f32 %v2586_v61  ;;  %vm517_vm11 = vmor %vm515_vm5, %vm516_vm6  ;;  %579 = vperm.xlu2 %2576, %v285_v54   ;;  %v2470_v55 = vld [vmem:[%s3814_s1 + $0x8] sm:$0xff]  ;;  %v2485_v54 = vld [vmem:[#allocation4 + $0x50] sm:$0xff] }
  0x4c   : > { %1522 = vperm.xlu1 %2575, %v296_v22   ;;  %v511_v10 = vmul.f32 %v2584_v60, %v510_v4  ;;  %vm527_vm12 = vmor %vm525_vm8, %vm526_vm9 }
  0x4d   : > { %1537 = vperm.xlu0 %2574, %v299_v23   ;;  %v521_v11 = vmul.f32 %v2586_v61, %v520_v5  ;;  %v502_v13 = vmul.f32 0.5, %v501_v9  ;;  %v493_v16 = vsub.f32 1.5, %v492_v12 }
  0x4e   : > { %v512_v14 = vmul.f32 0.5, %v511_v10 }
  0x4f   : > { %v522_v15 = vmul.f32 0.5, %v521_v11  ;;  %v503_v17 = vsub.f32 1.5, %v502_v13  ;;  %v494_v20 = vmul.f32 %v2580_v56, %v493_v16 }
  0x50   : > { %v513_v18 = vsub.f32 1.5, %v512_v14 }
  0x51   : > { %v523_v19 = vsub.f32 1.5, %v522_v15  ;;  %v504_v21 = vmul.f32 %v2582_v57, %v503_v17  ;;  %v498_v24 = vsel %vm497_vm7, %v2580_v56, %v494_v20  ;;  %v272_v56 = vld [vmem:[%s3814_s1 + $0x10] sm:$0xf]  ;;  %v2490_v20 = vld [vmem:[#allocation4 + $0x78] sm:$0xff] }
  0x52   : > { %v514_v22 = vmul.f32 %v2584_v60, %v513_v18  ;;  %v529_v30 = vmul.f32 %v498_v24, %v2850_v58  ;;  %v533_v34 = vmul.f32 %v498_v24, %v2852_v59  ;;  %v2481_v24 = vld [vmem:[#allocation4 + $0x30] sm:$0xff] }
  0x53   : > { %v524_v23 = vmul.f32 %v2586_v61, %v523_v19  ;;  %v508_v25 = vsel %vm507_vm10, %v2582_v57, %v504_v21  ;;  %v611_v57 = vunpack.c.l.b16 %v272_v56  ;;  %v2482_v19 = vld [vmem:[#allocation4 + $0x38] sm:$0xff]  ;;  %v2501_v56 = vld [vmem:[#allocation4 + $0xd0] sm:$0xff] }
  0x54   : > { %1962 = vperm.xlu1 %2575, %v300_v32   ;;  %v518_v26 = vsel %vm517_vm11, %v2584_v60, %v514_v22  ;;  %v530_v31 = vmul.f32 %v508_v25, %v2856_v62  ;;  %v534_v35 = vmul.f32 %v508_v25, %v2858_v63  ;;  %v2498_v21 = vld [vmem:[#allocation4 + $0xb8] sm:$0xff]  ;;  %v2489_v25 = vld [vmem:[#allocation4 + $0x70] sm:$0xff] }
  0x55   : > { %1527 = vperm.xlu0 %2574, %v297_v33   ;;  %v528_v27 = vsel %vm527_vm12, %v2586_v61, %v524_v23  ;;  %v531_v32 = vmul.f32 %v518_v26, %v2864_v2  ;;  %v535_v36 = vmul.f32 %v518_v26, %v2866_v3  ;;  %v614_v60 = vpack.c.b16 %v611_v57, %v611_v57  ;;  %v2506_v23 = vld [vmem:[#allocation4 + $0xf8] sm:$0xff]  ;;  %v2476_v57 = vld [vmem:[#allocation4 + $0x8] sm:$0xff] }
  0x56   : > { %v532_v33 = vmul.f32 %v528_v27, %v2872_v6  ;;  %v536_v37 = vmul.f32 %v528_v27, %v2874_v7  ;;  %v2497_v27 = vld [vmem:[#allocation4 + $0xb0] sm:$0xff] }
  0x5d   : > { %1967 = vperm.xlu0 %2574, %v301_v42  }
  0x86   : > { %v558_v28 = vpop.permute.xlu1 %557 }
  0x87   : > { %v540_v29 = vpop.permute.xlu0 %539 }
  0x88   : > { %v547_v38 = vmul.f32 %v540_v29, %v529_v30  ;;  %v548_v39 = vmul.f32 %v540_v29, %v530_v31  ;;  %v549_v40 = vmul.f32 %v540_v29, %v531_v32  ;;  %v550_v41 = vmul.f32 %v540_v29, %v532_v33  ;;  %v2480_v33 = vld [vmem:[#allocation4 + $0x28] sm:$0xff] }
  0x8a   : > { %v565_v45 = vadd.f32 %v558_v28, %v547_v38  ;;  %v566_v6 = vadd.f32 %v558_v28, %v548_v39  ;;  %v567_v46 = vadd.f32 %v558_v28, %v549_v40  ;;  %v568_v59 = vadd.f32 %v558_v28, %v550_v41  ;;  %v2505_v28 = vld [vmem:[#allocation4 + $0xf0] sm:$0xff] }
  0x8e   : > { %v563_v2 = vpop.permute.xlu1 %562 }
  0x8f   : > { %v545_v42 = vpop.permute.xlu0 %544 }
  0x90   : > { %v551_v58 = vmul.f32 %v545_v42, %v533_v34  ;;  %v552_v43 = vmul.f32 %v545_v42, %v534_v35  ;;  %v553_v62 = vmul.f32 %v545_v42, %v535_v36  ;;  %v554_v44 = vmul.f32 %v545_v42, %v536_v37  ;;  %v2488_v34 = vld [vmem:[#allocation4 + $0x68] sm:$0xff] }
  0x91   : > { %v2496_v35 = vld [vmem:[#allocation4 + $0xa8] sm:$0xff] }
  0x92   : > { %v569_v47 = vadd.f32 %v563_v2, %v551_v58  ;;  %v570_v63 = vadd.f32 %v563_v2, %v552_v43  ;;  %v571_v48 = vadd.f32 %v563_v2, %v553_v62  ;;  %v572_v3 = vadd.f32 %v563_v2, %v554_v44  ;;  %v2504_v36 = vld [vmem:[#allocation4 + $0xe8] sm:$0xff]  ;;  %v298_v62 = vld [vmem:[#allocation2 + $0x88] sm:$0xff] }
  0x94   : > { %v573_v49 = vpack.c.bf16 %v569_v47, %v565_v45  ;;  %v574_v7 = vpack.c.bf16 %v570_v63, %v566_v6  ;;  %v575_v50 = vpack.c.bf16 %v571_v48, %v567_v46  ;;  %v576_v51 = vpack.c.bf16 %v572_v3, %v568_v59  ;;  %v2479_v47 = vld [vmem:[#allocation4 + $0x20] sm:$0xff] }
  0x95   : > { %v2487_v63 = vld [vmem:[#allocation4 + $0x60] sm:$0xff] }
  0x96   : > { %632 = vmatpush.bf16.msra.mxu0 %v573_v49  ;;  %655 = vmatpush.bf16.msra.mxu1 %v574_v7  ;;  %v2495_v48 = vld [vmem:[#allocation4 + $0xa0] sm:$0xff]  ;;  %v2478_v49 = vld [vmem:[#allocation4 + $0x18] sm:$0xff] }
  0x97   : > { %678 = vmatpush.bf16.msra.mxu2 %v575_v50  ;;  %701 = vmatpush.bf16.msra.mxu3 %v576_v51  ;;  %v2503_v3 = vld [vmem:[#allocation4 + $0xe0] sm:$0xff]  ;;  %v2486_v7 = vld [vmem:[#allocation4 + $0x58] sm:$0xff] }
  0x98   : > { %v2494_v50 = vld [vmem:[#allocation4 + $0x98] sm:$0xff] }
  0x99   : > { %2149 = vmatmul.msk.bf16.vlgmr.msra.gmra.mxu0 %vm615_vm13, %v2469_v53  ;;  %2152 = vmatmul.msk.bf16.vlgmr.msra.gmra.mxu1 %vm615_vm13, %v2469_v53  ;;  %v2502_v51 = vld [vmem:[#allocation4 + $0xd8] sm:$0xff] }
  0x9a   : > { %2155 = vmatmul.msk.bf16.vlgmr.msra.gmra.mxu2 %vm615_vm13, %v2469_v53  ;;  %2158 = vmatmul.msk.bf16.vlgmr.msra.gmra.mxu3 %vm615_vm13, %v2469_v53  ;;  %v2477_v53 = vld [vmem:[#allocation4 + $0x10] sm:$0xff] }
  0x9b   : > { %952 = vmatpush.bf16.msrb.mxu0 %v2482_v19  ;;  %970 = vmatpush.bf16.msrb.mxu1 %v2490_v20 }
  0x9c   : > { %988 = vmatpush.bf16.msrb.mxu2 %v2498_v21  ;;  %1006 = vmatpush.bf16.msrb.mxu3 %v2506_v23 }
  0x9f   : > { %953 = vmatpush.bf16.msrb.mxu0 %v2481_v24  ;;  %971 = vmatpush.bf16.msrb.mxu1 %v2489_v25 }
  0xa0   : > { %989 = vmatpush.bf16.msrb.mxu2 %v2497_v27  ;;  %1007 = vmatpush.bf16.msrb.mxu3 %v2505_v28 }
  0xa3   : > { %954 = vmatpush.bf16.msrb.mxu0 %v2480_v33  ;;  %972 = vmatpush.bf16.msrb.mxu1 %v2488_v34 }
  0xa4   : > { %990 = vmatpush.bf16.msrb.mxu2 %v2496_v35  ;;  %1008 = vmatpush.bf16.msrb.mxu3 %v2504_v36 }
  0xa5   : > { %v580_v61 = vpop.permute.xlu2 %579 }
  0xa7   : > { %955 = vmatpush.bf16.msrb.mxu0 %v2479_v47  ;;  %973 = vmatpush.bf16.msrb.mxu1 %v2487_v63 }
  0xa8   : > { %991 = vmatpush.bf16.msrb.mxu2 %v2495_v48  ;;  %1009 = vmatpush.bf16.msrb.mxu3 %v2503_v3 }
  0xa9   : > { %2150 = vmatmul.msk.bf16.gmra.mxu0 %vm615_vm13, %v2470_v55  ;;  %2153 = vmatmul.msk.bf16.gmra.mxu1 %vm615_vm13, %v2470_v55 }
  0xaa   : > { %2156 = vmatmul.msk.bf16.gmra.mxu2 %vm615_vm13, %v2470_v55  ;;  %2159 = vmatmul.msk.bf16.gmra.mxu3 %vm615_vm13, %v2470_v55  ;;  %v2493_v55 = vld [vmem:[#allocation4 + $0x90] sm:$0xff] }
  0xab   : > { %956 = vmatpush.bf16.msrb.mxu0 %v2478_v49  ;;  %974 = vmatpush.bf16.msrb.mxu1 %v2486_v7 }
  0xac   : > { %992 = vmatpush.bf16.msrb.mxu2 %v2494_v50  ;;  %1010 = vmatpush.bf16.msrb.mxu3 %v2502_v51 }
  0xaf   : > { %957 = vmatpush.bf16.msrb.mxu0 %v2477_v53  ;;  %975 = vmatpush.bf16.msrb.mxu1 %v2485_v54 }
  0xb0   : > { %993 = vmatpush.bf16.msrb.mxu2 %v2493_v55  ;;  %1011 = vmatpush.bf16.msrb.mxu3 %v2501_v56 }
  0xb3   : > { %958 = vmatpush.bf16.msrb.mxu0 %v2476_v57 }
  0xb9   : > { %2151 = vmatmul.msk.bf16.gmra.mxu0 %vm615_vm13, %v614_v60  ;;  %2154 = vmatmul.msk.bf16.gmra.mxu1 %vm615_vm13, %v614_v60 }
  0xba   : > { %2157 = vmatmul.msk.bf16.gmra.mxu2 %vm615_vm13, %v614_v60  ;;  %2160 = vmatmul.msk.bf16.gmra.mxu3 %vm615_vm13, %v614_v60  ;;  %v2484_v60 = vld [vmem:[#allocation4 + $0x48] sm:$0xff] }
  0xbb   : > { %976 = vmatpush.bf16.msrb.mxu1 %v2484_v60  ;;  %v2405_v60 = vld [vmem:[%s3817_s4 + $0xf0] sm:$0xf0] }
 0x116   : > { %v634_v0 = vpop.f32.mrf.mxu0  ;;  %v657_v1 = vpop.f32.mrf.mxu1 }
 0x117   : > { %v2917_v4 = vadd.f32 %v634_v0, %v580_v61  ;;  %v2919_v5 = vadd.f32 %v657_v1, %v580_v61  ;;  %v2500_v0 = vld [vmem:[#allocation4 + $0xc8] sm:$0xff]  ;;  %v2475_v1 = vld [vmem:[#allocation4] sm:$0xff] }
 0x118   : > { %1012 = vmatpush.bf16.msrb.mxu3 %v2500_v0  ;;  %959 = vmatpush.bf16.msrb.mxu0 %v2475_v1  ;;  %v2538_v0 = vld [vmem:[%s3817_s4 + $0xf4] sm:$0xf0] }
 0x119   : > { %v718_v8 = vsel %vm717_vm14, %v2917_v4, -inf  ;;  %v719_v9 = vsel %vm717_vm14, %v2919_v5, -inf }
 0x11a   : > { %v722_v16 = vmax.f32 %v718_v8, %v719_v9  ;;  %v2483_v8 = vld [vmem:[#allocation4 + $0x40] sm:$0xff] }
 0x11b   : > { %v2491_v9 = vld [vmem:[#allocation4 + $0x80] sm:$0xff]  ;;  %977 = vmatpush.bf16.msrb.mxu1 %v2483_v8 }
 0x11d   : > { %v680_v10 = vpop.f32.mrf.mxu2  ;;  %v703_v11 = vpop.f32.mrf.mxu3 }
 0x11e   : > { %v2923_v12 = vadd.f32 %v680_v10, %v580_v61  ;;  %v2925_v13 = vadd.f32 %v703_v11, %v580_v61  ;;  %v2927_v14 = vpop.f32.mrf.mxu0  ;;  %v2929_v15 = vpop.f32.mrf.mxu1  ;;  %v2492_v61 = vld [vmem:[#allocation4 + $0x88] sm:$0xff]  ;;  %v2499_v10 = vld [vmem:[#allocation4 + $0xc0] sm:$0xff] }
 0x11f   : > { %994 = vmatpush.bf16.msrb.mxu2 %v2492_v61  ;;  %1013 = vmatpush.bf16.msrb.mxu3 %v2499_v10  ;;  %v2411_v61 = vld [vmem:[%s3817_s4 + $0xe8] sm:$0xf]  ;;  %v2413_v10 = vld [vmem:[%s3817_s4 + $0xf8] sm:$0xf0] }
 0x120   : > { %v720_v17 = vsel %vm717_vm14, %v2923_v12, -inf  ;;  %v721_v18 = vsel %vm717_vm14, %v2925_v13, -inf  ;;  %v2412_v8 = vor.u32 %v2538_v0, %v2411_v61  ;;  %v2323_v61 = vld [vmem:[%s3817_s4 + $0x40] sm:$0xf]  ;;  %v2517_v0 = vld [vmem:[%s3817_s4 + $0x4c] sm:$0xf0] }
 0x121   : > { %v723_v22 = vmax.f32 %v720_v17, %v721_v18 }
 0x123   : > { %v724_v26 = vmax.f32 %v722_v16, %v723_v22  ;;  %995 = vmatpush.bf16.msrb.mxu2 %v2491_v9  ;;  %v2536_v9 = vld [vmem:[%s3817_s4 + $0xec] sm:$0xf] }
 0x125   : > { %v2933_v29 = vpop.f32.mrf.mxu2  ;;  %v2935_v30 = vpop.f32.mrf.mxu3  ;;  %725 = vmax.xlane.f32.xlu2 %v724_v26 }
 0x126   : > { %v2937_v31 = vpop.f32.mrf.mxu0  ;;  %v2939_v32 = vpop.f32.mrf.mxu1 }
 0x127   : > { %v585_v26 = vpop.permute.xlu0 %584  ;;  %1218 = vmatpush.bf16.msra.mxu2 %v2412_v8  ;;  %v2324_v8 = vor.u32 %v2517_v0, %v2323_v61 }
 0x128   : > { %v637_v28 = vadd.f32 %v2927_v14, %v585_v26 }
 0x12d   : > { %v2941_v37 = vpop.f32.mrf.mxu2  ;;  %v2943_v38 = vpop.f32.mrf.mxu3 }
 0x12e   : > { %v2945_v39 = vpop.f32.mrf.mxu0  ;;  %v2947_v40 = vpop.f32.mrf.mxu1 }
 0x135   : > { %v2949_v41 = vpop.f32.mrf.mxu2  ;;  %v2951_v42 = vpop.f32.mrf.mxu3 }
 0x136   : > { %v2953_v58 = vpop.f32.mrf.mxu0  ;;  %v2955_v43 = vpop.f32.mrf.mxu1 }
 0x13d   : > { %v2957_v44 = vpop.f32.mrf.mxu2  ;;  %v2959_v2 = vpop.f32.mrf.mxu3  ;;  %1532 = vperm.xlu2 %2576, %v298_v62   ;;  %v706_v62 = vadd.f32 %v2935_v30, %v585_v26 }
 0x13e   : > { %v646_v45 = vpop.f32.mrf.mxu0  ;;  %v669_v6 = vpop.f32.mrf.mxu1 }
 0x145   : > { %v692_v46 = vpop.f32.mrf.mxu2  ;;  %v715_v59 = vpop.f32.mrf.mxu3 }
 0x198   : > { %v726_v11 = vpop.xlane.xlu2 %725 }
 0x199   : > { %v727_v16 = vperm.slane %v726_v11, 0  ;;  %v2387_v11 = vld [vmem:[%s3817_s4 + $0xc0] sm:$0xf] }
 0x19b   : > { %v728_v17 = vsub.f32 %v2917_v4, %v727_v16  ;;  %v729_v18 = vsub.f32 %v2919_v5, %v727_v16  ;;  %v730_v19 = vsub.f32 %v2923_v12, %v727_v16  ;;  %v731_v20 = vsub.f32 %v2925_v13, %v727_v16 }
 0x19c   : > { %v660_v5 = vadd.f32 %v2929_v15, %v585_v26  ;;  %v683_v13 = vadd.f32 %v2933_v29, %v585_v26  ;;  %v590_v15 = vpop.permute.xlu1 %589  ;;  %v2416_v16 = vor.u32 %v2536_v9, %v2413_v10  ;;  %v2397_v26 = vld [vmem:[%s3817_s4 + $0xd8] sm:$0xf0]  ;;  %v2325_v9 = vld [vmem:[%s3817_s4 + $0x50] sm:$0xf0]  ;;  %v2331_v10 = vld [vmem:[%s3817_s4 + $0x48] sm:$0xf] }
 0x19d   : > { %v732_v21 = vmul.f32 1.442695, %v728_v17  ;;  %v734_v22 = vmul.f32 1.442695, %v729_v18  ;;  %v736_v23 = vmul.f32 1.442695, %v730_v19  ;;  %v640_v3 = vadd.f32 %v2937_v31, %v590_v15 }
 0x19e   : > { %v738_v24 = vmul.f32 1.442695, %v731_v20  ;;  %v663_v29 = vadd.f32 %v2939_v32, %v590_v15  ;;  %v686_v49 = vadd.f32 %v2941_v37, %v590_v15  ;;  %v709_v7 = vadd.f32 %v2943_v38, %v590_v15  ;;  %v2403_v31 = vld [vmem:[%s3817_s4 + $0xe0] sm:$0xf]  ;;  %v2537_v32 = vld [vmem:[%s3817_s4 + $0xec] sm:$0xf0]  ;;  %1232 = vmatpush.bf16.msra.mxu3 %v2416_v16 }
 0x19f   : > { %2587 = vpow2.f32 %v732_v21  ;;  %v2535_v37 = vld [vmem:[%s3817_s4 + $0xe4] sm:$0xf]  ;;  %v2404_v38 = vor.u32 %v2537_v32, %v2403_v31  ;;  %v2533_v17 = vld [vmem:[%s3817_s4 + $0xcc] sm:$0xf0]  ;;  %v2389_v19 = vld [vmem:[%s3817_s4 + $0xd0] sm:$0xf0] }
 0x1a0   : > { %2589 = vpow2.f32 %v734_v22  ;;  %v2408_v1 = vor.u32 %v2535_v37, %v2405_v60  ;;  %v2531_v18 = vld [vmem:[%s3817_s4 + $0xc4] sm:$0xf]  ;;  %v2388_v20 = vor.u32 %v2533_v17, %v2387_v11  ;;  %v2395_v22 = vld [vmem:[%s3817_s4 + $0xc8] sm:$0xf]  ;;  %v2526_v15 = vld [vmem:[%s3817_s4 + $0x94] sm:$0xf0] }
 0x1a1   : > { %2591 = vpow2.f32 %v736_v23  ;;  %1190 = vmatpush.bf16.msra.mxu0 %v2404_v38  ;;  %v2392_v21 = vor.u32 %v2531_v18, %v2389_v19  ;;  %v2534_v23 = vld [vmem:[%s3817_s4 + $0xd4] sm:$0xf0]  ;;  %v2520_v37 = vld [vmem:[%s3817_s4 + $0x6c] sm:$0xf]  ;;  %v2349_v38 = vld [vmem:[%s3817_s4 + $0x78] sm:$0xf0] }
 0x1a2   : > { %2593 = vpow2.f32 %v738_v24  ;;  %1204 = vmatpush.bf16.msra.mxu1 %v2408_v1  ;;  %v2532_v24 = vld [vmem:[%s3817_s4 + $0xcc] sm:$0xf]  ;;  %v2352_v60 = vor.u32 %v2520_v37, %v2349_v38  ;;  %v2515_v1 = vld [vmem:[%s3817_s4 + $0x44] sm:$0xf]  ;;  %v2518_v11 = vld [vmem:[%s3817_s4 + $0x54] sm:$0xf0] }
 0x1a3   : > { %v2328_v16 = vor.u32 %v2515_v1, %v2325_v9  ;;  %v2332_v17 = vor.u32 %v2518_v11, %v2331_v10  ;;  %v2516_v18 = vld [vmem:[%s3817_s4 + $0x4c] sm:$0xf]  ;;  %v2333_v19 = vld [vmem:[%s3817_s4 + $0x58] sm:$0xf0] }
 0x1a5   : > { %v2588_v25 = vpop.eup %2587  ;;  %1191 = vmatpush.bf16.msra.mxu0 %v2388_v20  ;;  %v2336_v20 = vor.u32 %v2516_v18, %v2333_v19 }
 0x1a6   : > { %v2590_v27 = vpop.eup %2589  ;;  %v740_v4 = vperm.slane %v2588_v25, 0  ;;  %1205 = vmatpush.bf16.msra.mxu1 %v2392_v21  ;;  %v2307_v21 = vld [vmem:[%s3817_s4 + $0x20] sm:$0xf] }
 0x1a7   : > { %v2592_v33 = vpop.eup %2591  ;;  %v741_v12 = vperm.slane %v2590_v27, 0 }
 0x1a8   : > { %v2594_v34 = vpop.eup %2593  ;;  %v744_v35 = vmul.f32 %v740_v4, %v637_v28  ;;  %v742_v36 = vperm.slane %v2592_v33, 0  ;;  %v748_v30 = vmul.f32 %v740_v4, %v640_v3  ;;  %v2371_v28 = vld [vmem:[%s3817_s4 + $0xa0] sm:$0xf]  ;;  %v2529_v4 = vld [vmem:[%s3817_s4 + $0xac] sm:$0xf0] }
 0x1a9   : > { %v745_v45 = vmul.f32 %v741_v12, %v660_v5  ;;  %v743_v6 = vperm.slane %v2594_v34, 0  ;;  %v749_v50 = vmul.f32 %v741_v12, %v663_v29  ;;  %v2372_v5 = vor.u32 %v2529_v4, %v2371_v28  ;;  %v2373_v12 = vld [vmem:[%s3817_s4 + $0xb0] sm:$0xf0] }
 0x1aa   : > { %v752_v46 = vpack.c.bf16 %v744_v35, %v2588_v25  ;;  %v746_v59 = vmul.f32 %v742_v36, %v683_v13  ;;  %v750_v51 = vmul.f32 %v742_v36, %v686_v49  ;;  %v756_v54 = vpack.c.bf16 %v748_v30, %v748_v30  ;;  %v2530_v13 = vld [vmem:[%s3817_s4 + $0xb4] sm:$0xf0]  ;;  %v2524_v49 = vld [vmem:[%s3817_s4 + $0x8c] sm:$0xf]  ;;  %v2365_v30 = vld [vmem:[%s3817_s4 + $0x98] sm:$0xf0] }
 0x1ab   : > { %v753_v47 = vpack.c.bf16 %v745_v45, %v2590_v27  ;;  %v747_v63 = vmul.f32 %v743_v6, %v706_v62  ;;  %v751_v53 = vmul.f32 %v743_v6, %v709_v7  ;;  %v757_v55 = vpack.c.bf16 %v749_v50, %v749_v50  ;;  %v2528_v62 = vld [vmem:[%s3817_s4 + $0xac] sm:$0xf]  ;;  %v2381_v45 = vld [vmem:[%s3817_s4 + $0xb8] sm:$0xf0]  ;;  %1192 = vmatpush.bf16.msra.mxu0 %v2372_v5  ;;  %v2339_v50 = vld [vmem:[%s3817_s4 + $0x60] sm:$0xf] }
 0x1ac   : > { %960 = vmatmul.bf16.vlgmr.msrb.gmra.mxu0 %v752_v46  ;;  %v754_v14 = vpack.c.bf16 %v746_v59, %v2592_v33  ;;  %v758_v56 = vpack.c.bf16 %v750_v51, %v750_v51  ;;  %v2396_v25 = vor.u32 %v2534_v23, %v2395_v22  ;;  %v2400_v27 = vor.u32 %v2532_v24, %v2397_v26  ;;  %v2527_v33 = vld [vmem:[%s3817_s4 + $0xa4] sm:$0xf]  ;;  %v2355_v46 = vld [vmem:[%s3817_s4 + $0x80] sm:$0xf]  ;;  %v2525_v59 = vld [vmem:[%s3817_s4 + $0x8c] sm:$0xf0] }
 0x1ad   : > { %978 = vmatmul.bf16.vlgmr.msrb.gmra.mxu1 %v753_v47  ;;  %v755_v48 = vpack.c.bf16 %v747_v63, %v2594_v34  ;;  %v759_v57 = vpack.c.bf16 %v751_v53, %v751_v53  ;;  %v2379_v34 = vld [vmem:[%s3817_s4 + $0xa8] sm:$0xf]  ;;  %v2376_v35 = vor.u32 %v2527_v33, %v2373_v12  ;;  %v2384_v6 = vor.u32 %v2528_v62, %v2381_v45  ;;  %v2523_v47 = vld [vmem:[%s3817_s4 + $0x84] sm:$0xf]  ;;  %v2521_v51 = vld [vmem:[%s3817_s4 + $0x6c] sm:$0xf0] }
 0x1ae   : > { %996 = vmatmul.bf16.vlgmr.msrb.gmra.mxu2 %v754_v14  ;;  %1233 = vmatpush.bf16.msra.mxu3 %v2400_v27  ;;  %v2380_v36 = vor.u32 %v2530_v13, %v2379_v34  ;;  %v2356_v63 = vor.u32 %v2525_v59, %v2355_v46  ;;  %v2357_v14 = vld [vmem:[%s3817_s4 + $0x90] sm:$0xf0]  ;;  %v2368_v7 = vor.u32 %v2524_v49, %v2365_v30  ;;  %v2519_v53 = vld [vmem:[%s3817_s4 + $0x64] sm:$0xf]  ;;  %v2513_v22 = vld [vmem:[%s3817_s4 + $0x2c] sm:$0xf0] }
 0x1af   : > { %1014 = vmatmul.bf16.vlgmr.msrb.gmra.mxu3 %v755_v48  ;;  %1219 = vmatpush.bf16.msra.mxu2 %v2396_v25  ;;  %v2363_v48 = vld [vmem:[%s3817_s4 + $0x88] sm:$0xf]  ;;  %v2360_v3 = vor.u32 %v2523_v47, %v2357_v14  ;;  %v2511_v23 = vld [vmem:[%s3817_s4 + $0x24] sm:$0xf]  ;;  %v2308_v24 = vor.u32 %v2513_v22, %v2307_v21  ;;  %v2309_v25 = vld [vmem:[%s3817_s4 + $0x30] sm:$0xf0] }
 0x1b0   : > { %1206 = vmatpush.bf16.msra.mxu1 %v2376_v35  ;;  %v2364_v29 = vor.u32 %v2526_v15, %v2363_v48  ;;  %1193 = vmatpush.bf16.msra.mxu0 %v2356_v63  ;;  %v2315_v26 = vld [vmem:[%s3817_s4 + $0x28] sm:$0xf]  ;;  %v2514_v27 = vld [vmem:[%s3817_s4 + $0x34] sm:$0xf0]  ;;  %v2312_v28 = vor.u32 %v2511_v23, %v2309_v25  ;;  %v2512_v33 = vld [vmem:[%s3817_s4 + $0x2c] sm:$0xf]  ;;  %v600_v23 = vpop.permute.xlu1 %599 }
 0x1b1   : > { %v2316_v4 = vor.u32 %v2514_v27, %v2315_v26  ;;  %v2317_v5 = vld [vmem:[%s3817_s4 + $0x38] sm:$0xf0]  ;;  %v2291_v34 = vld [vmem:[%s3817_s4] sm:$0xf]  ;;  %v2509_v13 = vld [vmem:[%s3817_s4 + $0xc] sm:$0xf0]  ;;  %v645_v27 = vadd.f32 %v2953_v58, %v600_v23  ;;  %v691_v58 = vadd.f32 %v2957_v44, %v600_v23 }
 0x1b2   : > { %1234 = vmatpush.bf16.msra.mxu3 %v2384_v6  ;;  %v2320_v12 = vor.u32 %v2512_v33, %v2317_v5  ;;  %v2507_v35 = vld [vmem:[%s3817_s4 + $0x4] sm:$0xf]  ;;  %v2293_v62 = vld [vmem:[%s3817_s4 + $0x10] sm:$0xf0]  ;;  %v2299_v45 = vld [vmem:[%s3817_s4 + $0x8] sm:$0xf] }
 0x1b3   : > { %1220 = vmatpush.bf16.msra.mxu2 %v2380_v36  ;;  %v2292_v36 = vor.u32 %v2509_v13, %v2291_v34  ;;  %v2510_v6 = vld [vmem:[%s3817_s4 + $0x14] sm:$0xf0]  ;;  %v2296_v46 = vor.u32 %v2507_v35, %v2293_v62  ;;  %v2508_v47 = vld [vmem:[%s3817_s4 + $0xc] sm:$0xf]  ;;  %v2301_v63 = vld [vmem:[%s3817_s4 + $0x18] sm:$0xf0] }
 0x1b4   : > { %1207 = vmatpush.bf16.msra.mxu1 %v2360_v3  ;;  %v2300_v59 = vor.u32 %v2510_v6, %v2299_v45  ;;  %v2304_v14 = vor.u32 %v2508_v47, %v2301_v63  ;;  %v1250_v5 = vmax.f32 %v645_v27, 0.0  ;;  %v2471_v63 = vld [vmem:[%s3814_s1 + $0x18] sm:$0xff] }
 0x1b6   : > { %1235 = vmatpush.bf16.msra.mxu3 %v2368_v7 }
 0x1b7   : > { %1221 = vmatpush.bf16.msra.mxu2 %v2364_v29 }
 0x1ba   : > { %1236 = vmatpush.bf16.msra.mxu3 %v2352_v60 }
 0x1bc   : > { %965 = vmatmul.bf16.gmra.mxu0 %v756_v54  ;;  %v2340_v54 = vor.u32 %v2521_v51, %v2339_v50 }
 0x1bd   : > { %983 = vmatmul.bf16.gmra.mxu1 %v757_v55  ;;  %v2341_v55 = vld [vmem:[%s3817_s4 + $0x70] sm:$0xf0] }
 0x1be   : > { %1001 = vmatmul.bf16.gmra.mxu2 %v758_v56  ;;  %v2347_v56 = vld [vmem:[%s3817_s4 + $0x68] sm:$0xf]  ;;  %v2344_v31 = vor.u32 %v2519_v53, %v2341_v55  ;;  %1194 = vmatpush.bf16.msra.mxu0 %v2340_v54 }
 0x1bf   : > { %1019 = vmatmul.bf16.gmra.mxu3 %v759_v57  ;;  %v2522_v57 = vld [vmem:[%s3817_s4 + $0x74] sm:$0xf0] }
 0x1c0   : > { %v2348_v32 = vor.u32 %v2522_v57, %v2347_v56  ;;  %1208 = vmatpush.bf16.msra.mxu1 %v2344_v31  ;;  %1237 = vmatpush.bf16.msra.mxu3 %v2336_v20 }
 0x1c2   : > { %1222 = vmatpush.bf16.msra.mxu2 %v2348_v32  ;;  %1195 = vmatpush.bf16.msra.mxu0 %v2324_v8 }
 0x1c4   : > { %1209 = vmatpush.bf16.msra.mxu1 %v2328_v16  ;;  %1238 = vmatpush.bf16.msra.mxu3 %v2320_v12 }
 0x1c6   : > { %1223 = vmatpush.bf16.msra.mxu2 %v2332_v17  ;;  %1196 = vmatpush.bf16.msra.mxu0 %v2308_v24  ;;  %v595_v24 = vpop.permute.xlu0 %594 }
 0x1c7   : > { %v642_v25 = vadd.f32 %v2945_v39, %v595_v24  ;;  %v665_v26 = vadd.f32 %v2947_v40, %v595_v24  ;;  %v688_v35 = vadd.f32 %v2949_v41, %v595_v24  ;;  %v711_v40 = vadd.f32 %v2951_v42, %v595_v24 }
 0x1c8   : > { %1210 = vmatpush.bf16.msra.mxu1 %v2312_v28  ;;  %1239 = vmatpush.bf16.msra.mxu3 %v2304_v14  ;;  %v668_v28 = vadd.f32 %v2955_v43, %v600_v23  ;;  %v714_v43 = vadd.f32 %v2959_v2, %v600_v23 }
 0x1c9   : > { %v1247_v33 = vmax.f32 %v665_v26, 0.0  ;;  %v1248_v14 = vmax.f32 %v688_v35, 0.0  ;;  %v1249_v41 = vmax.f32 %v711_v40, 0.0  ;;  %v2673_v35 = vld [vmem:[%s2836_s13 + $0x10] sm:$0xff] }
 0x1ca   : > { %1224 = vmatpush.bf16.msra.mxu2 %v2316_v4  ;;  %1197 = vmatpush.bf16.msra.mxu0 %v2292_v36  ;;  %v1246_v4 = vmax.f32 %v642_v25, 0.0  ;;  %v1251_v12 = vmax.f32 %v668_v28, 0.0 }
 0x1cc   : > { %1211 = vmatpush.bf16.msra.mxu1 %v2296_v46 }
 0x1ce   : > { %1225 = vmatpush.bf16.msra.mxu2 %v2300_v59 }
 0x229   : > { %v961_v48 = vpop.f32.mrf.mxu0 }
 0x22a   : > { %v979_v15 = vpop.f32.mrf.mxu1 }
 0x22b   : > { %v980_v3 = vadd.f32 %v979_v15, %v961_v48  ;;  %v1252_v48 = vmax.f32 %v691_v58, 0.0  ;;  %v1253_v15 = vmax.f32 %v714_v43, 0.0 }
 0x231   : > { %v997_v29 = vpop.f32.mrf.mxu2  ;;  %v963_v49 = vpop.f32.mrf.mxu0 }
 0x232   : > { %v998_v30 = vadd.f32 %v997_v29, %v980_v3  ;;  %v1015_v7 = vpop.f32.mrf.mxu3  ;;  %v981_v50 = vpop.f32.mrf.mxu1 }
 0x233   : > { %v982_v31 = vadd.f32 %v981_v50, %v963_v49 }
 0x234   : > { %v1016_v51 = vadd.f32 %v1015_v7, %v998_v30 }
 0x236   : > { %v1024_v53 = vadd.f32 1e-30, %v1016_v51 }
 0x238   : > { %2595 = vrcp.f32 %v1024_v53  ;;  %v1269_v53 = vpop.permute.xlu0 %1268 }
 0x239   : > { %v999_v54 = vpop.f32.mrf.mxu2  ;;  %v966_v55 = vpop.f32.mrf.mxu0 }
 0x23a   : > { %v1017_v56 = vpop.f32.mrf.mxu3  ;;  %v984_v57 = vpop.f32.mrf.mxu1  ;;  %v1000_v37 = vadd.f32 %v999_v54, %v982_v31 }
 0x23b   : > { %v985_v38 = vadd.f32 %v984_v57, %v966_v55  ;;  %v1274_v54 = vpop.permute.xlu1 %1273 }
 0x23c   : > { %v1018_v10 = vadd.f32 %v1017_v56, %v1000_v37 }
 0x23e   : > { %v2596_v32 = vpop.eup %2595 }
 0x23f   : > { %v1026_v0 = vperm.slane %v2596_v32, 0 }
 0x241   : > { %v1002_v60 = vpop.f32.mrf.mxu2  ;;  %v968_v61 = vpop.f32.mrf.mxu0  ;;  %v1027_v16 = vmul.f32 %v1026_v0, %v1018_v10 }
 0x242   : > { %v1003_v1 = vadd.f32 %v1002_v60, %v985_v38  ;;  %v1020_v8 = vpop.f32.mrf.mxu3  ;;  %v986_v9 = vpop.f32.mrf.mxu1  ;;  %v2669_v38 = vld [vmem:[%s2836_s13] sm:$0xff]  ;;  %v2670_v61 = vld [vmem:[%s2836_s13 + $0x8] sm:$0xff] }
 0x243   : > { %v2672_v9 = vld [vmem:[%s2836_s13 + $0x28] sm:$0xff] }
 0x244   : > { %v1021_v11 = vadd.f32 %v1020_v8, %v1003_v1  ;;  %v2671_v1 = vld [vmem:[%s2836_s13 + $0x20] sm:$0xff] }
 0x246   : > { %v1028_v17 = vmul.f32 %v1026_v0, %v1021_v11 }
 0x248   : > { %v1029_v18 = vpack.c.bf16 %v1028_v17, %v1027_v16 }
 0x249   : > { %v1004_v19 = vpop.f32.mrf.mxu2 }
 0x24a   : > { %v1022_v20 = vpop.f32.mrf.mxu3  ;;  %1198 = vmatmul.bf16.vlgmr.msra.gmra.mxu0 %v1029_v18  ;;  %1212 = vmatmul.bf16.vlgmr.msra.gmra.mxu1 %v1029_v18 }
 0x24b   : > { %1226 = vmatmul.bf16.vlgmr.msra.gmra.mxu2 %v1029_v18  ;;  %1240 = vmatmul.bf16.vlgmr.msra.gmra.mxu3 %v1029_v18 }
 0x2c7   : > { %v1199_v21 = vpop.f32.mrf.mxu0  ;;  %v1213_v22 = vpop.f32.mrf.mxu1 }
 0x2c8   : > { %v1254_v45 = vmul.f32 %v1246_v4, %v1199_v21  ;;  %v1255_v6 = vmul.f32 %v1247_v33, %v1213_v22 }
 0x2ce   : > { %v1227_v34 = vpop.f32.mrf.mxu2  ;;  %v1241_v13 = vpop.f32.mrf.mxu3 }
 0x2cf   : > { %v1201_v36 = vpop.f32.mrf.mxu0  ;;  %v1215_v62 = vpop.f32.mrf.mxu1  ;;  %v1256_v3 = vmul.f32 %v1248_v14, %v1227_v34  ;;  %v1257_v42 = vmul.f32 %v1249_v41, %v1241_v13 }
 0x2d0   : > { %v1258_v46 = vmul.f32 %v1250_v5, %v1201_v36  ;;  %v1259_v39 = vmul.f32 %v1251_v12, %v1215_v62  ;;  %v2674_v62 = vld [vmem:[%s2836_s13 + $0x18] sm:$0xff] }
 0x2d2   : > { %v1262_v59 = vpack.c.bf16 %v1258_v46, %v1254_v45  ;;  %v1263_v47 = vpack.c.bf16 %v1259_v39, %v1255_v6  ;;  %v2675_v6 = vld [vmem:[%s2836_s13 + $0x30] sm:$0xff]  ;;  %v2676_v39 = vld [vmem:[%s2836_s13 + $0x38] sm:$0xff] }
 0x2d4   : > { %1291 = vmatpush.bf16.msrb.mxu0 %v1262_v59  ;;  %1305 = vmatpush.bf16.msrb.mxu1 %v1263_v47 }
 0x2d6   : > { %v1229_v29 = vpop.f32.mrf.mxu2  ;;  %v1243_v49 = vpop.f32.mrf.mxu3 }
 0x2d7   : > { %v1260_v30 = vmul.f32 %v1252_v48, %v1229_v29  ;;  %v1261_v44 = vmul.f32 %v1253_v15, %v1243_v49  ;;  %2421 = vmatmul.msk.bf16.vlgmr.msrb.gmra.mxu0 %vm615_vm13, %v2471_v63  ;;  %2422 = vmatmul.msk.bf16.vlgmr.msrb.gmra.mxu1 %vm615_vm13, %v2471_v63 }
 0x2d9   : > { %v1264_v2 = vpack.c.bf16 %v1260_v30, %v1256_v3  ;;  %v1265_v7 = vpack.c.bf16 %v1261_v44, %v1257_v42 }
 0x2db   : > { %1319 = vmatpush.bf16.msrb.mxu2 %v1264_v2  ;;  %1333 = vmatpush.bf16.msrb.mxu3 %v1265_v7 }
 0x2de   : > { %2423 = vmatmul.msk.bf16.vlgmr.msrb.gmra.mxu2 %vm615_vm13, %v2471_v63  ;;  %2424 = vmatmul.msk.bf16.vlgmr.msrb.gmra.mxu3 %vm615_vm13, %v2471_v63 }
 0x354   : > { %v1293_v50 = vpop.f32.mrf.mxu0  ;;  %v1307_v51 = vpop.f32.mrf.mxu1 }
 0x355   : > { %v1294_v55 = vadd.f32 %v1293_v50, %v1269_v53  ;;  %v1308_v56 = vadd.f32 %v1307_v51, %v1269_v53 }
 0x357   : > { %v3181_v60 = vadd.f32 %v2669_v38, %v1294_v55  ;;  %v3184_v0 = vadd.f32 %v2670_v61, %v1308_v56 }
 0x35c   : > { %v1295_v57 = vpop.f32.mrf.mxu0  ;;  %v1309_v31 = vpop.f32.mrf.mxu1 }
 0x35d   : > { %v1296_v32 = vadd.f32 %v1295_v57, %v1274_v54  ;;  %v1310_v37 = vadd.f32 %v1309_v31, %v1274_v54 }
 0x35f   : > { %v3187_v8 = vadd.f32 %v2671_v1, %v1296_v32  ;;  %v3190_v10 = vadd.f32 %v2672_v9, %v1310_v37 }
 0x361   : > { %v1348_v11 = vadd.f32 %v3187_v8, %v3181_v60  ;;  %v1355_v16 = vadd.f32 %v3190_v10, %v3184_v0  ;;  %v1321_v17 = vpop.f32.mrf.mxu2  ;;  %v1335_v18 = vpop.f32.mrf.mxu3 }
 0x362   : > { %v1322_v25 = vadd.f32 %v1321_v17, %v1269_v53  ;;  %v1336_v26 = vadd.f32 %v1335_v18, %v1269_v53 }
 0x363   : > { %v1349_v19 = vrot.slane %v1348_v11, 4  ;;  %v1356_v20 = vrot.slane %v1355_v16, 4 }
 0x364   : > { %v3197_v36 = vadd.f32 %v2673_v35, %v1322_v25  ;;  %v3200_v45 = vadd.f32 %v2674_v62, %v1336_v26 }
 0x365   : > { %v1350_v21 = vadd.f32 %v1349_v19, %v1348_v11  ;;  %v1357_v22 = vadd.f32 %v1356_v20, %v1355_v16 }
 0x367   : > { %v1351_v23 = vrot.slane %v1350_v21, 2  ;;  %v1358_v24 = vrot.slane %v1357_v22, 2 }
 0x369   : > { %v1352_v27 = vadd.f32 %v1351_v23, %v1350_v21  ;;  %v1359_v28 = vadd.f32 %v1358_v24, %v1357_v22  ;;  %v1323_v4 = vpop.f32.mrf.mxu2  ;;  %v1337_v33 = vpop.f32.mrf.mxu3 }
 0x36a   : > { %v1324_v5 = vadd.f32 %v1323_v4, %v1274_v54  ;;  %v1338_v12 = vadd.f32 %v1337_v33, %v1274_v54 }
 0x36b   : > { %v1353_v34 = vrot.slane %v1352_v27, 1  ;;  %v1360_v13 = vrot.slane %v1359_v28, 1 }
 0x36c   : > { %v3203_v46 = vadd.f32 %v2675_v6, %v1324_v5  ;;  %v3206_v40 = vadd.f32 %v2676_v39, %v1338_v12 }
 0x36d   : > { %v1354_v58 = vadd.f32 %v1353_v34, %v1352_v27  ;;  %v1361_v43 = vadd.f32 %v1360_v13, %v1359_v28 }
 0x36e   : > { %v1362_v59 = vadd.f32 %v3203_v46, %v3197_v36  ;;  %v1369_v47 = vadd.f32 %v3206_v40, %v3200_v45 }
 0x36f   : > { %v1376_v63 = vmul.f32 %v1354_v58, %v2846_v52  ;;  %v1377_v14 = vmul.f32 %v1361_v43, %v2846_v52 }
 0x370   : > { %v1363_v41 = vrot.slane %v1362_v59, 4  ;;  %v1370_v48 = vrot.slane %v1369_v47, 4 }
 0x371   : > { %v3215_v15 = vsub.f32 %v3181_v60, %v1376_v63  ;;  %v3218_v3 = vsub.f32 %v3187_v8, %v1376_v63  ;;  %v3221_v29 = vsub.f32 %v3184_v0, %v1377_v14  ;;  %v3224_v49 = vsub.f32 %v3190_v10, %v1377_v14 }
 0x372   : > { %v1364_v42 = vadd.f32 %v1363_v41, %v1362_v59  ;;  %v1371_v30 = vadd.f32 %v1370_v48, %v1369_v47 }
 0x373   : > { %v1388_v44 = vmul.f32 %v3215_v15, %v3215_v15  ;;  %v1392_v2 = vmul.f32 %v3218_v3, %v3218_v3  ;;  %v1389_v7 = vmul.f32 %v3221_v29, %v3221_v29  ;;  %v1393_v50 = vmul.f32 %v3224_v49, %v3224_v49 }
 0x374   : > { %v1365_v51 = vrot.slane %v1364_v42, 2  ;;  %v1372_v53 = vrot.slane %v1371_v30, 2 }
 0x375   : > { %v1396_v54 = vadd.f32 %v1392_v2, %v1388_v44  ;;  %v1403_v55 = vadd.f32 %v1393_v50, %v1389_v7 }
 0x376   : > { %v1366_v56 = vadd.f32 %v1365_v51, %v1364_v42  ;;  %v1373_v57 = vadd.f32 %v1372_v53, %v1371_v30 }
 0x377   : > { %v1397_v31 = vrot.slane %v1396_v54, 4  ;;  %v1404_v32 = vrot.slane %v1403_v55, 4 }
 0x378   : > { %v1367_v37 = vrot.slane %v1366_v56, 1  ;;  %v1374_v38 = vrot.slane %v1373_v57, 1 }
 0x379   : > { %v1398_v61 = vadd.f32 %v1397_v31, %v1396_v54  ;;  %v1405_v1 = vadd.f32 %v1404_v32, %v1403_v55  ;;  %v3260_v32 = vpop.permute.xlu1 %1487 }
 0x37a   : > { %v1368_v9 = vadd.f32 %v1367_v37, %v1366_v56  ;;  %v1375_v11 = vadd.f32 %v1374_v38, %v1373_v57  ;;  %v3262_v37 = vpop.permute.xlu0 %1482 }
 0x37b   : > { %v1399_v16 = vrot.slane %v1398_v61, 2  ;;  %v1406_v17 = vrot.slane %v1405_v1, 2 }
 0x37c   : > { %v1378_v18 = vmul.f32 %v1368_v9, %v2846_v52  ;;  %v1379_v19 = vmul.f32 %v1375_v11, %v2846_v52 }
 0x37d   : > { %v1400_v20 = vadd.f32 %v1399_v16, %v1398_v61  ;;  %v1407_v21 = vadd.f32 %v1406_v17, %v1405_v1 }
 0x37e   : > { %v3237_v22 = vsub.f32 %v3197_v36, %v1378_v18  ;;  %v3240_v23 = vsub.f32 %v3203_v46, %v1378_v18  ;;  %v3243_v24 = vsub.f32 %v3200_v45, %v1379_v19  ;;  %v3246_v25 = vsub.f32 %v3206_v40, %v1379_v19 }
 0x37f   : > { %v1401_v26 = vrot.slane %v1400_v20, 1  ;;  %v1408_v27 = vrot.slane %v1407_v21, 1 }
 0x380   : > { %v1390_v28 = vmul.f32 %v3237_v22, %v3237_v22  ;;  %v1394_v4 = vmul.f32 %v3240_v23, %v3240_v23  ;;  %v1391_v33 = vmul.f32 %v3243_v24, %v3243_v24  ;;  %v1395_v5 = vmul.f32 %v3246_v25, %v3246_v25 }
 0x381   : > { %v1402_v12 = vadd.f32 %v1401_v26, %v1400_v20  ;;  %v1409_v34 = vadd.f32 %v1408_v27, %v1407_v21 }
 0x382   : > { %v1410_v13 = vadd.f32 %v1394_v4, %v1390_v28  ;;  %v1417_v35 = vadd.f32 %v1395_v5, %v1391_v33 }
 0x383   : > { %v1424_v62 = vmul.f32 %v1402_v12, %v2846_v52  ;;  %v1425_v6 = vmul.f32 %v1409_v34, %v2846_v52  ;;  %v1506_v34 = vpop.permute.xlu1 %1505 }
 0x384   : > { %v1411_v39 = vrot.slane %v1410_v13, 4  ;;  %v1418_v58 = vrot.slane %v1417_v35, 4 }
 0x385   : > { %v1428_v43 = vadd.f32 1e-05, %v1424_v62  ;;  %v1429_v59 = vadd.f32 1e-05, %v1425_v6 }
 0x386   : > { %v1412_v47 = vadd.f32 %v1411_v39, %v1410_v13  ;;  %v1419_v63 = vadd.f32 %v1418_v58, %v1417_v35  ;;  %v1501_v13 = vpop.permute.xlu0 %1500 }
 0x387   : > { %2597 = vrsqrt.f32 %v1428_v43  ;;  %vm1438_vm1 = vweird.f32 %v1428_v43  ;;  %vm1448_vm3 = vweird.f32 %v1429_v59 }
 0x388   : > { %2599 = vrsqrt.f32 %v1429_v59  ;;  %v1413_v14 = vrot.slane %v1412_v47, 2  ;;  %v1420_v41 = vrot.slane %v1419_v63, 2 }
 0x38a   : > { %v1414_v48 = vadd.f32 %v1413_v14, %v1412_v47  ;;  %v1421_v42 = vadd.f32 %v1420_v41, %v1419_v63  ;;  %v2472_v14 = vld [vmem:[%s3814_s1 + $0x20] sm:$0xff] }
 0x38c   : > { %v1415_v30 = vrot.slane %v1414_v48, 1  ;;  %v1422_v44 = vrot.slane %v1421_v42, 1 }
 0x38d   : > { %v2598_v2 = vpop.eup %2597 }
 0x38e   : > { %v2600_v7 = vpop.eup %2599  ;;  %v1433_v50 = vmul.f32 %v2598_v2, %v1428_v43  ;;  %v1416_v51 = vadd.f32 %v1415_v30, %v1414_v48  ;;  %v1423_v53 = vadd.f32 %v1422_v44, %v1421_v42  ;;  %vm1439_vm15 = vweird.f32 %v2598_v2 }
 0x38f   : > { %v1443_v54 = vmul.f32 %v2600_v7, %v1429_v59  ;;  %vm1449_vm0 = vweird.f32 %v2600_v7  ;;  %vm1440_vm2 = vmor %vm1438_vm1, %vm1439_vm15 }
 0x390   : > { %v1434_v55 = vmul.f32 %v2598_v2, %v1433_v50  ;;  %v1426_v56 = vmul.f32 %v1416_v51, %v2846_v52  ;;  %v1427_v57 = vmul.f32 %v1423_v53, %v2846_v52  ;;  %vm1450_vm4 = vmor %vm1448_vm3, %vm1449_vm0 }
 0x391   : > { %v1444_v31 = vmul.f32 %v2600_v7, %v1443_v54 }
 0x392   : > { %v1435_v38 = vmul.f32 0.5, %v1434_v55  ;;  %v1430_v61 = vadd.f32 1e-05, %v1426_v56  ;;  %v1431_v1 = vadd.f32 1e-05, %v1427_v57 }
 0x393   : > { %v1445_v9 = vmul.f32 0.5, %v1444_v31 }
 0x394   : > { %v1436_v11 = vsub.f32 1.5, %v1435_v38  ;;  %2601 = vrsqrt.f32 %v1430_v61  ;;  %vm1458_vm7 = vweird.f32 %v1430_v61  ;;  %vm1468_vm9 = vweird.f32 %v1431_v1 }
 0x395   : > { %v1446_v16 = vsub.f32 1.5, %v1445_v9  ;;  %2603 = vrsqrt.f32 %v1431_v1 }
 0x396   : > { %v1437_v17 = vmul.f32 %v2598_v2, %v1436_v11 }
 0x397   : > { %v1447_v18 = vmul.f32 %v2600_v7, %v1446_v16 }
 0x398   : > { %v1441_v52 = vsel %vm1440_vm2, %v2598_v2, %v1437_v17 }
 0x399   : > { %v1472_v19 = vmul.f32 %v1441_v52, %v3215_v15  ;;  %v1476_v20 = vmul.f32 %v1441_v52, %v3218_v3  ;;  %v1451_v21 = vsel %vm1450_vm4, %v2600_v7, %v1447_v18 }
 0x39a   : > { %v2602_v26 = vpop.eup %2601  ;;  %v1473_v27 = vmul.f32 %v1451_v21, %v3221_v29  ;;  %v1477_v28 = vmul.f32 %v1451_v21, %v3224_v49 }
 0x39b   : > { %v2604_v4 = vpop.eup %2603  ;;  %v1494_v33 = vmul.f32 %v3260_v32, %v1476_v20  ;;  %v1453_v5 = vmul.f32 %v2602_v26, %v1430_v61  ;;  %v1490_v12 = vmul.f32 %v3262_v37, %v1472_v19  ;;  %vm1459_vm5 = vweird.f32 %v2602_v26 }
 0x39c   : > { %v1495_v35 = vmul.f32 %v3260_v32, %v1477_v28  ;;  %v1463_v62 = vmul.f32 %v2604_v4, %v1431_v1  ;;  %v1491_v15 = vmul.f32 %v3262_v37, %v1473_v27  ;;  %vm1469_vm6 = vweird.f32 %v2604_v4  ;;  %vm1460_vm8 = vmor %vm1458_vm7, %vm1459_vm5 }
 0x39d   : > { %v1454_v3 = vmul.f32 %v2602_v26, %v1453_v5  ;;  %v1508_v6 = vadd.f32 %v1501_v13, %v1490_v12  ;;  %v1512_v39 = vadd.f32 %v1506_v34, %v1494_v33  ;;  %vm1470_vm10 = vmor %vm1468_vm9, %vm1469_vm6  ;;  %v3318_v12 = vpop.permute.xlu2 %1532 }
 0x39e   : > { %v1464_v58 = vmul.f32 %v2604_v4, %v1463_v62  ;;  %v1509_v29 = vadd.f32 %v1501_v13, %v1491_v15  ;;  %v1513_v43 = vadd.f32 %v1506_v34, %v1495_v35 }
 0x39f   : > { %v1455_v49 = vmul.f32 0.5, %v1454_v3  ;;  %v1516_v59 = vpack.c.bf16 %v1512_v39, %v1508_v6 }
 0x3a0   : > { %v1465_v47 = vmul.f32 0.5, %v1464_v58  ;;  %v1517_v63 = vpack.c.bf16 %v1513_v43, %v1509_v29 }
 0x3a1   : > { %v1456_v41 = vsub.f32 1.5, %v1455_v49  ;;  %1563 = vmatpush.bf16.msra.mxu0 %v1516_v59 }
 0x3a2   : > { %v1466_v48 = vsub.f32 1.5, %v1465_v47  ;;  %1582 = vmatpush.bf16.msra.mxu1 %v1517_v63 }
 0x3a3   : > { %v1457_v42 = vmul.f32 %v2602_v26, %v1456_v41 }
 0x3a4   : > { %v1467_v30 = vmul.f32 %v2604_v4, %v1466_v48  ;;  %2433 = vmatmul.msk.bf16.vlgmr.msra.gmra.mxu0 %vm615_vm13, %v2472_v14 }
 0x3a5   : > { %v1461_v44 = vsel %vm1460_vm8, %v2602_v26, %v1457_v42  ;;  %2435 = vmatmul.msk.bf16.vlgmr.msra.gmra.mxu1 %vm615_vm13, %v2472_v14 }
 0x3a6   : > { %v1474_v2 = vmul.f32 %v1461_v44, %v3237_v22  ;;  %v1478_v7 = vmul.f32 %v1461_v44, %v3240_v23  ;;  %v1471_v50 = vsel %vm1470_vm10, %v2604_v4, %v1467_v30  ;;  %v2473_v23 = vld [vmem:[%s3814_s1 + $0x28] sm:$0xff] }
 0x3a7   : > { %v1475_v51 = vmul.f32 %v1471_v50, %v3243_v24  ;;  %v1479_v53 = vmul.f32 %v1471_v50, %v3246_v25  ;;  %v3294_v24 = vpop.permute.xlu0 %1537  ;;  %v3296_v25 = vpop.permute.xlu1 %1522 }
 0x3a8   : > { %v1496_v54 = vmul.f32 %v3260_v32, %v1478_v7  ;;  %v1492_v55 = vmul.f32 %v3262_v37, %v1474_v2 }
 0x3a9   : > { %v1497_v56 = vmul.f32 %v3260_v32, %v1479_v53  ;;  %v1493_v57 = vmul.f32 %v3262_v37, %v1475_v51 }
 0x3aa   : > { %v1510_v31 = vadd.f32 %v1501_v13, %v1492_v55  ;;  %v1514_v38 = vadd.f32 %v1506_v34, %v1496_v54 }
 0x3ab   : > { %v1511_v61 = vadd.f32 %v1501_v13, %v1493_v57  ;;  %v1515_v1 = vadd.f32 %v1506_v34, %v1497_v56 }
 0x3ac   : > { %v1518_v22 = vpack.c.bf16 %v1514_v38, %v1510_v31 }
 0x3ad   : > { %v1519_v9 = vpack.c.bf16 %v1515_v1, %v1511_v61 }
 0x3ae   : > { %1601 = vmatpush.bf16.msra.mxu2 %v1518_v22 }
 0x3af   : > { %1620 = vmatpush.bf16.msra.mxu3 %v1519_v9  ;;  %v3306_v52 = vpop.permute.xlu0 %1527 }
 0x3b1   : > { %2437 = vmatmul.msk.bf16.vlgmr.msra.gmra.mxu2 %vm615_vm13, %v2472_v14 }
 0x3b2   : > { %2439 = vmatmul.msk.bf16.vlgmr.msra.gmra.mxu3 %vm615_vm13, %v2472_v14 }
 0x3b4   : > { %2434 = vmatmul.msk.bf16.gmra.mxu0 %vm615_vm13, %v2473_v23 }
 0x3b5   : > { %2436 = vmatmul.msk.bf16.gmra.mxu1 %vm615_vm13, %v2473_v23 }
 0x3c1   : > { %2438 = vmatmul.msk.bf16.gmra.mxu2 %vm615_vm13, %v2473_v23 }
 0x3c2   : > { %2440 = vmatmul.msk.bf16.gmra.mxu3 %vm615_vm13, %v2473_v23 }
 0x421   : > { %v1565_v32 = vpop.f32.mrf.mxu0 }
 0x422   : > { %v3299_v37 = vadd.f32 %v1565_v32, %v3296_v25  ;;  %v1584_v11 = vpop.f32.mrf.mxu1 }
 0x423   : > { %v3302_v16 = vadd.f32 %v1584_v11, %v3296_v25 }
 0x424   : > { %v2441_v17 = vmul.f32 -1.442695, %v3299_v37 }
 0x425   : > { %v2442_v18 = vmul.f32 -1.442695, %v3302_v16 }
 0x426   : > { %2605 = vpow2.f32 %v2441_v17 }
 0x427   : > { %2607 = vpow2.f32 %v2442_v18 }
 0x429   : > { %v1567_v19 = vpop.f32.mrf.mxu0 }
 0x42a   : > { %v3309_v20 = vadd.f32 %v1567_v19, %v3306_v52  ;;  %v1586_v21 = vpop.f32.mrf.mxu1 }
 0x42b   : > { %v3312_v26 = vadd.f32 %v1586_v21, %v3306_v52 }
 0x42c   : > { %v2445_v27 = vmul.f32 -1.442695, %v3309_v20  ;;  %v2606_v28 = vpop.eup %2605 }
 0x42d   : > { %v2446_v4 = vmul.f32 -1.442695, %v3312_v26  ;;  %v2608_v33 = vpop.eup %2607  ;;  %v3316_v5 = vadd.f32 1.0, %v2606_v28 }
 0x42e   : > { %2609 = vpow2.f32 %v2445_v27  ;;  %v3323_v62 = vadd.f32 1.0, %v2608_v33 }
 0x42f   : > { %2611 = vpow2.f32 %v2446_v4  ;;  %v1705_v38 = vand.u32 2147483647, %v3316_v5  ;;  %v1707_v32 = vand.u32 2147483648, %v3316_v5  ;;  %vm1701_vm11 = vweird.f32 %v3316_v5 }
 0x430   : > { %2613 = vrcp.f32 %v3316_v5  ;;  %v1722_v11 = vand.u32 2147483648, %v3323_v62  ;;  %vm1716_vm14 = vweird.f32 %v3323_v62 }
 0x431   : > { %v1570_v34 = vpop.f32.mrf.mxu0  ;;  %vm3383_vm13 = vcmp.eq.f32.partialorder %v1705_v38, 8.507059e+37 }
 0x432   : > { %v3321_v13 = vadd.f32 %v1570_v34, %v3318_v12  ;;  %v1589_v35 = vpop.f32.mrf.mxu1 }
 0x433   : > { %v3326_v15 = vadd.f32 %v1589_v35, %v3318_v12 }
 0x434   : > { %v2610_v3 = vpop.eup %2609  ;;  %v2449_v6 = vmul.f32 -1.442695, %v3321_v13  ;;  %v1603_v29 = vpop.f32.mrf.mxu2 }
 0x435   : > { %v2450_v39 = vmul.f32 -1.442695, %v3326_v15  ;;  %v3331_v58 = vadd.f32 1.0, %v2610_v3  ;;  %v2612_v43 = vpop.eup %2611  ;;  %v3337_v59 = vadd.f32 %v1603_v29, %v3296_v25  ;;  %v1622_v14 = vpop.f32.mrf.mxu3  ;;  %v3396_v29 = vor.u32 1.1754944e-38, %v1722_v11 }
 0x436   : > { %2615 = vpow2.f32 %v2449_v6  ;;  %v3334_v49 = vadd.f32 1.0, %v2612_v43  ;;  %v3339_v47 = vpop.eup %2613  ;;  %v3366_v1 = vadd.f32 %v1622_v14, %v3296_v25  ;;  %v1720_v25 = vand.u32 2147483647, %v3323_v62 }
 0x437   : > { %2617 = vrcp.f32 %v3323_v62  ;;  %v1697_v48 = vmul.f32 %v3339_v47, %v3316_v5  ;;  %v2443_v42 = vmul.f32 -1.442695, %v3337_v59  ;;  %vm1702_vm12 = vweird.f32 %v3339_v47 }
 0x438   : > { %2619 = vpow2.f32 %v2450_v39  ;;  %v1765_v33 = vand.u32 2147483647, %v3331_v58  ;;  %v2444_v34 = vmul.f32 -1.442695, %v3366_v1  ;;  %v1708_v39 = vor.u32 1.1754944e-38, %v1707_v32  ;;  %vm3411_vm1 = vmor %vm1701_vm11, %vm1702_vm12 }
 0x439   : > { %2621 = vrcp.f32 %v3331_v58  ;;  %v1572_v44 = vpop.f32.mrf.mxu0  ;;  %v1698_v51 = vsub.f32 1.0, %v1697_v48  ;;  %vm1761_vm0 = vweird.f32 %v3331_v58  ;;  %vm1776_vm4 = vweird.f32 %v3334_v49 }
 0x43a   : > { %2623 = vrcp.f32 %v3334_v49  ;;  %v3355_v53 = vadd.f32 %v1572_v44, %v3294_v24  ;;  %v1591_v56 = vpop.f32.mrf.mxu1  ;;  %vm3424_vm2 = vcmp.eq.f32.partialorder %v1765_v33, 8.507059e+37 }
 0x43b   : > { %2625 = vpow2.f32 %v2443_v42  ;;  %v1699_v22 = vmul.f32 %v3339_v47, %v1698_v51  ;;  %v3372_v23 = vadd.f32 %v1591_v56, %v3294_v24  ;;  %v1780_v51 = vand.u32 2147483647, %v3334_v49 }
 0x43c   : > { %v2616_v63 = vpop.eup %2615  ;;  %v1605_v54 = vpop.f32.mrf.mxu2  ;;  %v2453_v9 = vmul.f32 -1.442695, %v3355_v53 }
 0x43d   : > { %v3342_v41 = vpop.eup %2617  ;;  %v3348_v30 = vadd.f32 1.0, %v2616_v63  ;;  %v1624_v18 = vpop.f32.mrf.mxu3  ;;  %v1700_v35 = vadd.f32 %v3339_v47, %v1699_v22  ;;  %v2454_v3 = vmul.f32 -1.442695, %v3372_v23  ;;  %v3394_v6 = vadd.f32 %v1605_v54, %v3306_v52 }
 0x43e   : > { %v2620_v2 = vpop.eup %2619  ;;  %v1712_v50 = vmul.f32 %v3342_v41, %v3323_v62  ;;  %vm1717_vm15 = vweird.f32 %v3342_v41  ;;  %v1782_v54 = vand.u32 2147483648, %v3334_v49  ;;  %v3436_v11 = vadd.f32 %v1624_v18, %v3306_v52 }
 0x43f   : > { %v3350_v7 = vpop.eup %2621  ;;  %2627 = vrcp.f32 %v3348_v30  ;;  %v3358_v55 = vadd.f32 1.0, %v2620_v2  ;;  %v1704_v56 = vsel %vm3411_vm1, %v3339_v47, %v1700_v35  ;;  %v2447_v38 = vmul.f32 -1.442695, %v3394_v6  ;;  %vm3450_vm5 = vmor %vm1716_vm14, %vm1717_vm15 }
 0x440   : > { %v3360_v57 = vpop.eup %2623  ;;  %v1757_v31 = vmul.f32 %v3350_v7, %v3331_v58  ;;  %v1713_v61 = vsub.f32 1.0, %v1712_v50  ;;  %v1767_v50 = vand.u32 2147483648, %v3331_v58  ;;  %vm1762_vm3 = vweird.f32 %v3350_v7 }
 0x441   : > { %2629 = vrcp.f32 %v3358_v55  ;;  %v1772_v17 = vmul.f32 %v3360_v57, %v3334_v49  ;;  %v2626_v19 = vpop.eup %2625  ;;  %v3444_v33 = vsel %vm3383_vm13, %v1708_v39, %v1704_v56  ;;  %vm3454_vm6 = vcmp.eq.f32.partialorder %v1780_v51, 8.507059e+37  ;;  %vm3463_vm7 = vmor %vm1761_vm0, %vm1762_vm3 }
 0x442   : > { %v1758_v21 = vsub.f32 1.0, %v1757_v31  ;;  %v1714_v4 = vmul.f32 %v3342_v41, %v1713_v61  ;;  %2631 = vpow2.f32 %v2453_v9  ;;  %v3398_v63 = vadd.f32 1.0, %v2626_v19 }
 0x443   : > { %v1773_v43 = vsub.f32 1.0, %v1772_v17  ;;  %2633 = vpow2.f32 %v2444_v34  ;;  %v1768_v17 = vor.u32 1.1754944e-38, %v1767_v50  ;;  %v1827_v19 = vand.u32 2147483648, %v3348_v30 }
 0x444   : > { %v1759_v48 = vmul.f32 %v3350_v7, %v1758_v21  ;;  %v1608_v44 = vpop.f32.mrf.mxu2  ;;  %v3422_v31 = vadd.f32 %v3342_v41, %v1714_v4  ;;  %2635 = vpow2.f32 %v2454_v3  ;;  %v1783_v18 = vor.u32 1.1754944e-38, %v1782_v54 }
 0x445   : > { %v3380_v27 = vpop.eup %2627  ;;  %v1774_v61 = vmul.f32 %v3360_v57, %v1773_v43  ;;  %2637 = vrcp.f32 %v3398_v63  ;;  %v1627_v4 = vpop.f32.mrf.mxu3  ;;  %v1825_v35 = vand.u32 2147483647, %v3348_v30  ;;  %vm1777_vm8 = vweird.f32 %v3360_v57 }
 0x446   : > { %v1817_v42 = vmul.f32 %v3380_v27, %v3348_v30  ;;  %v1760_v9 = vadd.f32 %v3350_v7, %v1759_v48  ;;  %2639 = vpow2.f32 %v2447_v38  ;;  %v2448_v50 = vmul.f32 -1.442695, %v3436_v11  ;;  %vm3489_vm10 = vmor %vm1776_vm4, %vm1777_vm8 }
 0x447   : > { %v3400_v14 = vpop.eup %2629  ;;  %v1775_v39 = vadd.f32 %v3360_v57, %v1774_v61  ;;  %vm1821_vm9 = vweird.f32 %v3348_v30  ;;  %v1828_v54 = vor.u32 1.1754944e-38, %v1827_v19  ;;  %v3485_v38 = vadd.f32 %v1608_v44, %v3318_v12 }
 0x448   : > { %v1832_v22 = vmul.f32 %v3400_v14, %v3358_v55  ;;  %v2632_v47 = vpop.eup %2631  ;;  %v1818_v32 = vsub.f32 1.0, %v1817_v42  ;;  %v1764_v58 = vsel %vm3463_vm7, %v3350_v7, %v1760_v9  ;;  %vm1822_vm11 = vweird.f32 %v3380_v27 }
 0x449   : > { %v3440_v21 = vadd.f32 1.0, %v2632_v47  ;;  %v2634_v3 = vpop.eup %2633  ;;  %vm3494_vm12 = vcmp.eq.f32.partialorder %v1825_v35, 8.507059e+37  ;;  %vm1836_vm13 = vweird.f32 %v3358_v55  ;;  %v1840_v47 = vand.u32 2147483647, %v3358_v55  ;;  %vm3534_vm14 = vmor %vm1821_vm9, %vm1822_vm11 }
 0x44a   : > { %v1833_v43 = vsub.f32 1.0, %v1832_v22  ;;  %v2636_v48 = vpop.eup %2635  ;;  %v1819_v2 = vmul.f32 %v3380_v27, %v1818_v32  ;;  %v1842_v44 = vand.u32 2147483648, %v3358_v55  ;;  %v1769_v49 = vsel %vm3424_vm2, %v1768_v17, %v1764_v58 }
 0x44b   : > { %2641 = vrcp.f32 %v3440_v21  ;;  %v3479_v51 = vpop.eup %2637  ;;  %v3482_v56 = vadd.f32 1.0, %v2636_v48  ;;  %v1779_v32 = vsel %vm3489_vm10, %v3360_v57, %v1775_v39  ;;  %v3509_v28 = vadd.f32 1.0, %v2634_v3 }
 0x44c   : > { %v2640_v61 = vpop.eup %2639  ;;  %v1610_v9 = vpop.f32.mrf.mxu2  ;;  %v1834_v19 = vmul.f32 %v3400_v14, %v1833_v43  ;;  %v1820_v35 = vadd.f32 %v3380_v27, %v1819_v2  ;;  %v1727_v5 = vmul.f32 %v3479_v51, %v3398_v63  ;;  %v2451_v17 = vmul.f32 -1.442695, %v3485_v38 }
 0x44d   : > { %2643 = vrcp.f32 %v3482_v56  ;;  %v3511_v48 = vadd.f32 1.0, %v2640_v61  ;;  %v3517_v58 = vadd.f32 %v1627_v4, %v3318_v12  ;;  %v3520_v57 = vadd.f32 %v1610_v9, %v3294_v24  ;;  %v1629_v52 = vpop.f32.mrf.mxu3 }
 0x44e   : > { %2645 = vpow2.f32 %v2448_v50  ;;  %v3523_v39 = vmul.f32 %v1769_v49, %v3309_v20  ;;  %v3527_v3 = vsel %vm3454_vm6, %v1783_v18, %v1779_v32  ;;  %v1843_v43 = vor.u32 1.1754944e-38, %v1842_v44 }
 0x44f   : > { %v1835_v4 = vadd.f32 %v3400_v14, %v1834_v19  ;;  %vm1837_vm15 = vweird.f32 %v3400_v14  ;;  %v1885_v20 = vand.u32 2147483647, %v3440_v21  ;;  %2647 = vrcp.f32 %v3511_v48 }
 0x450   : > { %v1824_v18 = vsel %vm3534_vm14, %v3380_v27, %v1820_v35  ;;  %vm3545_vm0 = vcmp.eq.f32.partialorder %v1840_v47, 8.507059e+37  ;;  %2649 = vrcp.f32 %v3509_v28  ;;  %v1887_v61 = vand.u32 2147483648, %v3440_v21  ;;  %vm3557_vm1 = vmor %vm1836_vm13, %vm1837_vm15 }
 0x451   : > { %v2642_v42 = vpop.eup %2641  ;;  %v1728_v44 = vsub.f32 1.0, %v1727_v5  ;;  %2651 = vpow2.f32 %v2451_v17  ;;  %v2452_v9 = vmul.f32 -1.442695, %v3517_v58  ;;  %v2455_v49 = vmul.f32 -1.442695, %v3520_v57 }
 0x452   : > { %v1877_v2 = vmul.f32 %v2642_v42, %v3440_v21  ;;  %vm1882_vm2 = vweird.f32 %v2642_v42  ;;  %v3563_v35 = vadd.f32 %v1629_v52, %v3294_v24  ;;  %vm3567_vm3 = vcmp.eq.f32.partialorder %v1720_v25, 8.507059e+37 }
 0x453   : > { %v2644_v22 = vpop.eup %2643  ;;  %v1829_v55 = vsel %vm3494_vm12, %v1828_v54, %v1824_v18  ;;  %v1839_v17 = vsel %vm3557_vm1, %v3400_v14, %v1835_v4  ;;  %vm1881_vm4 = vweird.f32 %v3440_v21  ;;  %vm3577_vm6 = vcmp.eq.f32.partialorder %v1885_v20, 8.507059e+37 }
 0x454   : > { %v1878_v30 = vsub.f32 1.0, %v1877_v2  ;;  %v2646_v32 = vpop.eup %2645  ;;  %v1892_v19 = vmul.f32 %v2644_v22, %v3482_v56  ;;  %v1888_v12 = vor.u32 1.1754944e-38, %v1887_v61  ;;  %2653 = vpow2.f32 %v2452_v9  ;;  %vm1883_vm7 = vmor %vm1881_vm4, %vm1882_vm2 }
 0x455   : > { %v3581_v25 = vpop.eup %2647  ;;  %v1900_v7 = vand.u32 2147483647, %v3482_v56  ;;  %v1902_v54 = vand.u32 2147483648, %v3482_v56  ;;  %v3585_v52 = vadd.f32 1.0, %v2646_v32  ;;  %2655 = vpow2.f32 %v2455_v49 }
 0x456   : > { %v1879_v47 = vmul.f32 %v2642_v42, %v1878_v30  ;;  %v1893_v62 = vsub.f32 1.0, %v1892_v19  ;;  %v3587_v14 = vpop.eup %2649  ;;  %vm1897_vm8 = vweird.f32 %v2644_v22  ;;  %v2456_v20 = vmul.f32 -1.442695, %v3563_v35 }
 0x457   : > { %v2652_v18 = vpop.eup %2651  ;;  %v1944_v30 = vmul.f32 %v1829_v55, %v3321_v13  ;;  %v1729_v61 = vmul.f32 %v3479_v51, %v1728_v44  ;;  %v1787_v32 = vmul.f32 %v3581_v25, %v3511_v48  ;;  %vm1896_vm9 = vweird.f32 %v3482_v56 }
 0x458   : > { %v1880_v24 = vadd.f32 %v2642_v42, %v1879_v47  ;;  %v1894_v4 = vmul.f32 %v2644_v22, %v1893_v62  ;;  %v1844_v47 = vsel %vm3545_vm0, %v1843_v43, %v1839_v17  ;;  %v1742_v13 = vmul.f32 %v3587_v14, %v3509_v28  ;;  %vm1898_vm10 = vmor %vm1896_vm9, %vm1897_vm8 }
 0x459   : > { %v1903_v44 = vor.u32 1.1754944e-38, %v1902_v54  ;;  %2657 = vrcp.f32 %v3585_v52  ;;  %vm1901_vm11 = vcmp.eq.f32.partialorder %v1900_v7, 8.507059e+37  ;;  %v1936_v56 = vmul.f32 %v3444_v33, %v3299_v37 }
 0x45a   : > { %v1884_v21 = vsel %vm1883_vm7, %v2642_v42, %v1880_v24  ;;  %v1895_v27 = vadd.f32 %v2644_v22, %v1894_v4  ;;  %v3598_v42 = vadd.f32 1.0, %v2652_v18  ;;  %v2654_v19 = vpop.eup %2653  ;;  %2659 = vpow2.f32 %v2456_v20 }
 0x45b   : > { %v1889_v9 = vsel %vm3577_vm6, %v1888_v12, %v1884_v21  ;;  %v1788_v12 = vsub.f32 1.0, %v1787_v32  ;;  %v3846_v43 = vsel %vm3450_vm5, %v3342_v41, %v3422_v31  ;;  %v1735_v17 = vand.u32 2147483647, %v3398_v63 }
 0x45c   : > { %v1948_v49 = vmul.f32 %v1889_v9, %v3355_v53  ;;  %v1899_v2 = vsel %vm1898_vm10, %v2644_v22, %v1895_v27  ;;  %v2656_v53 = vpop.eup %2655  ;;  %2661 = vrcp.f32 %v3598_v42  ;;  %v1724_v50 = vsel %vm3567_vm3, %v3396_v29, %v3846_v43 }
 0x45d   : > { %v1904_v24 = vsel %vm1901_vm11, %v1903_v44, %v1899_v2  ;;  %v1945_v22 = vmul.f32 %v1844_v47, %v3326_v15  ;;  %v1941_v37 = vmul.f32 %v3527_v3, %v3312_v26  ;;  %v1743_v33 = vsub.f32 1.0, %v1742_v13  ;;  %v3636_v26 = vld [vmem:[%s3814_s1 + $0x30] sm:$0xff] }
 0x45e   : > { %v1956_v55 = vpack.c.bf16 %v1948_v49, %v1944_v30  ;;  %v1949_v62 = vmul.f32 %v1904_v24, %v3372_v23  ;;  %v3621_v7 = vadd.f32 1.0, %v2654_v19  ;;  %v3623_v34 = vadd.f32 1.0, %v2656_v53 }
 0x45f   : > { %v1730_v41 = vadd.f32 %v3479_v51, %v1729_v61  ;;  %vm1732_vm5 = vweird.f32 %v3479_v51  ;;  %v1952_v15 = vpack.c.bf16 %v3523_v39, %v1936_v56  ;;  %v3628_v31 = vpop.eup %2657  ;;  %v1737_v23 = vand.u32 2147483648, %v3398_v63 }
 0x460   : > { %1985 = vmatpush.bf16.msrb.mxu0 %v1956_v55  ;;  %v1957_v29 = vpack.c.bf16 %v1949_v62, %v1945_v22  ;;  %v1789_v5 = vmul.f32 %v3581_v25, %v1788_v12  ;;  %2663 = vrcp.f32 %v3621_v7  ;;  %v2660_v3 = vpop.eup %2659  ;;  %v1937_v54 = vmul.f32 %v1724_v50, %v3302_v16 }
 0x461   : > { %vm1731_vm12 = vweird.f32 %v3398_v63  ;;  %vm1975_vm13 = vcmask 261120   ;;  %vm3648_vm15 = vcmp.eq.f32.partialorder %v1735_v17, 8.507059e+37  ;;  %v1744_v20 = vmul.f32 %v3587_v14, %v1743_v33 }
 0x462   : > { %1999 = vmatpush.bf16.msrb.mxu1 %v1957_v29  ;;  %v3640_v39 = vpop.eup %2661  ;;  %vm3644_vm14 = vmor %vm1731_vm12, %vm1732_vm5  ;;  %v1795_v16 = vand.u32 2147483647, %v3511_v48  ;;  %2665 = vrcp.f32 %v3623_v34  ;;  %v1802_v18 = vmul.f32 %v3628_v31, %v3585_v52  ;;  %v1953_v61 = vpack.c.bf16 %v1941_v37, %v1937_v54 }
 0x463   : > { %v1734_v63 = vsel %vm3644_vm14, %v3479_v51, %v1730_v41  ;;  %v1847_v30 = vmul.f32 %v3640_v39, %v3598_v42  ;;  %v1738_v9 = vor.u32 1.1754944e-38, %v1737_v23  ;;  %v1790_v32 = vadd.f32 %v3581_v25, %v1789_v5 }
 0x464   : > { %1986 = vmatpush.bf16.msrb.mxu0 %v1952_v15  ;;  %vm1792_vm0 = vweird.f32 %v3581_v25  ;;  %v1797_v49 = vand.u32 2147483648, %v3511_v48  ;;  %v1750_v27 = vand.u32 2147483647, %v3509_v28  ;;  %v1752_v51 = vand.u32 2147483648, %v3509_v28 }
 0x465   : > { %v1848_v47 = vsub.f32 1.0, %v1847_v30  ;;  %v3669_v13 = vadd.f32 1.0, %v2660_v3  ;;  %v3675_v19 = vsel %vm3648_vm15, %v1738_v9, %v1734_v63  ;;  %v3678_v55 = vadd.f32 %v3587_v14, %v1744_v20 }
 0x466   : > { %2000 = vmatpush.bf16.msrb.mxu1 %v1953_v61  ;;  %v3671_v44 = vpop.eup %2663  ;;  %vm1791_vm1 = vweird.f32 %v3511_v48  ;;  %vm3681_vm2 = vcmp.eq.f32.partialorder %v1795_v16, 8.507059e+37  ;;  %v1803_v56 = vsub.f32 1.0, %v1802_v18  ;;  %v1798_v50 = vor.u32 1.1754944e-38, %v1797_v49 }
 0x467   : > { %2461 = vmatmul.msk.bf16.vlgmr.msrb.gmra.mxu0 %vm1975_vm13, %v3636_v26  ;;  %vm3685_vm3 = vmor %vm1791_vm1, %vm1792_vm0  ;;  %v1849_v24 = vmul.f32 %v3640_v39, %v1848_v47  ;;  %v1862_v12 = vmul.f32 %v3671_v44, %v3621_v7  ;;  %2667 = vrcp.f32 %v3669_v13  ;;  %v1855_v22 = vand.u32 2147483647, %v3598_v42 }
 0x468   : > { %v2666_v43 = vpop.eup %2665  ;;  %v1794_v48 = vsel %vm3685_vm3, %v3581_v25, %v1790_v32  ;;  %v1857_v17 = vand.u32 2147483648, %v3598_v42  ;;  %vm1747_vm4 = vweird.f32 %v3587_v14  ;;  %vm1852_vm6 = vweird.f32 %v3640_v39 }
 0x469   : > { %2462 = vmatmul.msk.bf16.vlgmr.msrb.gmra.mxu1 %vm1975_vm13, %v3636_v26  ;;  %v1850_v62 = vadd.f32 %v3640_v39, %v1849_v24  ;;  %v1863_v37 = vsub.f32 1.0, %v1862_v12  ;;  %v1907_v33 = vmul.f32 %v2666_v43, %v3623_v34  ;;  %vm1806_vm7 = vweird.f32 %v3585_v52 }
 0x46a   : > { %vm1807_vm8 = vweird.f32 %v3628_v31  ;;  %v1810_v25 = vand.u32 2147483647, %v3585_v52  ;;  %v1812_v41 = vand.u32 2147483648, %v3585_v52  ;;  %vm1746_vm9 = vweird.f32 %v3509_v28  ;;  %v1963_v28 = vpop.permute.xlu1 %1962 }
 0x46b   : > { %v1804_v29 = vmul.f32 %v3628_v31, %v1803_v56  ;;  %vm1851_vm10 = vweird.f32 %v3598_v42  ;;  %v1864_v15 = vmul.f32 %v3671_v44, %v1863_v37  ;;  %v1908_v23 = vsub.f32 1.0, %v1907_v33 }
 0x46c   : > { %v1799_v5 = vsel %vm3681_vm2, %v1798_v50, %v1794_v48  ;;  %vm3714_vm11 = vmor %vm1851_vm10, %vm1852_vm6  ;;  %vm3718_vm5 = vcmp.eq.f32.partialorder %v1855_v22, 8.507059e+37  ;;  %v1858_v21 = vor.u32 1.1754944e-38, %v1857_v17  ;;  %v1917_v4 = vand.u32 2147483648, %v3623_v34 }
 0x46d   : > { %v2668_v20 = vpop.eup %2667  ;;  %v1854_v42 = vsel %vm3714_vm11, %v3640_v39, %v1850_v62  ;;  %v1909_v16 = vmul.f32 %v2666_v43, %v1908_v23  ;;  %vm1912_vm12 = vweird.f32 %v2666_v43  ;;  %v1915_v63 = vand.u32 2147483647, %v3623_v34  ;;  %vm3750_vm10 = vmor %vm1806_vm7, %vm1807_vm8 }
 0x46e   : > { %v1865_v18 = vadd.f32 %v3671_v44, %v1864_v15  ;;  %vm1866_vm14 = vweird.f32 %v3621_v7  ;;  %vm1867_vm15 = vweird.f32 %v3671_v44  ;;  %v1922_v30 = vmul.f32 %v2668_v20, %v3669_v13  ;;  %vm3760_vm11 = vmor %vm1746_vm9, %vm1747_vm4 }
 0x46f   : > { %v1805_v61 = vadd.f32 %v3628_v31, %v1804_v29  ;;  %v1872_v9 = vand.u32 2147483648, %v3621_v7  ;;  %v1910_v32 = vadd.f32 %v2666_v43, %v1909_v16  ;;  %vm1911_vm0 = vweird.f32 %v3623_v34  ;;  %vm3737_vm2 = vmor %vm1866_vm14, %vm1867_vm15 }
 0x470   : > { %v1859_v39 = vsel %vm3718_vm5, %v1858_v21, %v1854_v42  ;;  %v1870_v49 = vand.u32 2147483647, %v3621_v7  ;;  %vm1913_vm1 = vmor %vm1911_vm0, %vm1912_vm12  ;;  %v1918_v47 = vor.u32 1.1754944e-38, %v1917_v4  ;;  %v1923_v2 = vsub.f32 1.0, %v1922_v30 }
 0x471   : > { %v1914_v56 = vsel %vm1913_vm1, %v2666_v43, %v1910_v32  ;;  %vm1916_vm3 = vcmp.eq.f32.partialorder %v1915_v63, 8.507059e+37  ;;  %v1930_v24 = vand.u32 2147483647, %v3669_v13  ;;  %v1932_v12 = vand.u32 2147483648, %v3669_v13 }
 0x472   : > { %v1869_v34 = vsel %vm3737_vm2, %v3671_v44, %v1865_v18  ;;  %v1919_v48 = vsel %vm1916_vm3, %v1918_v47, %v1914_v56  ;;  %v1924_v50 = vmul.f32 %v2668_v20, %v1923_v2  ;;  %vm1927_vm6 = vweird.f32 %v2668_v20 }
 0x473   : > { %v1813_v43 = vor.u32 1.1754944e-38, %v1812_v41  ;;  %v1946_v22 = vmul.f32 %v1859_v39, %v3485_v38  ;;  %v1873_v17 = vor.u32 1.1754944e-38, %v1872_v9  ;;  %v1950_v62 = vmul.f32 %v1919_v48, %v3520_v57 }
 0x474   : > { %v1809_v52 = vsel %vm3750_vm10, %v3628_v31, %v1805_v61  ;;  %vm1871_vm7 = vcmp.eq.f32.partialorder %v1870_v49, 8.507059e+37  ;;  %v1925_v37 = vadd.f32 %v2668_v20, %v1924_v50  ;;  %vm1926_vm8 = vweird.f32 %v3669_v13 }
 0x475   : > { %v1942_v38 = vmul.f32 %v1799_v5, %v3394_v6  ;;  %v1874_v33 = vsel %vm1871_vm7, %v1873_v17, %v1869_v34  ;;  %v1958_v57 = vpack.c.bf16 %v1950_v62, %v1946_v22  ;;  %vm1928_vm5 = vmor %vm1926_vm8, %vm1927_vm6  ;;  %v1933_v41 = vor.u32 1.1754944e-38, %v1932_v12 }
 0x476   : > { %v1749_v29 = vsel %vm3760_vm11, %v3587_v14, %v3678_v55  ;;  %vm1811_vm4 = vcmp.eq.f32.partialorder %v1810_v25, 8.507059e+37  ;;  %v1929_v15 = vsel %vm1928_vm5, %v2668_v20, %v1925_v37  ;;  %vm1931_vm9 = vcmp.eq.f32.partialorder %v1930_v24, 8.507059e+37 }
 0x477   : > { %v1938_v31 = vmul.f32 %v3675_v19, %v3337_v59  ;;  %v1753_v13 = vor.u32 1.1754944e-38, %v1752_v51  ;;  %v1814_v23 = vsel %vm1811_vm4, %v1813_v43, %v1809_v52  ;;  %v1934_v6 = vsel %vm1931_vm9, %v1933_v41, %v1929_v15  ;;  %2013 = vmatpush.bf16.msrb.mxu2 %v1958_v57  ;;  %v1968_v19 = vpop.permute.xlu0 %1967 }
 0x478   : > { %vm1751_vm12 = vcmp.eq.f32.partialorder %v1750_v27, 8.507059e+37  ;;  %v1947_v5 = vmul.f32 %v1874_v33, %v3517_v58  ;;  %v1951_v14 = vmul.f32 %v1934_v6, %v3563_v35  ;;  %v1943_v3 = vmul.f32 %v1814_v23, %v3436_v11 }
 0x479   : > { %v1754_v55 = vsel %vm1751_vm12, %v1753_v13, %v1749_v29  ;;  %v1954_v25 = vpack.c.bf16 %v1942_v38, %v1938_v31 }
 0x47a   : > { %v1959_v54 = vpack.c.bf16 %v1951_v14, %v1947_v5  ;;  %v1939_v59 = vmul.f32 %v1754_v55, %v3366_v1 }
 0x47b   : > { %2014 = vmatpush.bf16.msrb.mxu2 %v1954_v25 }
 0x47c   : > { %2027 = vmatpush.bf16.msrb.mxu3 %v1959_v54  ;;  %v1955_v51 = vpack.c.bf16 %v1943_v3, %v1939_v59 }
 0x47e   : > { %2463 = vmatmul.msk.bf16.vlgmr.msrb.gmra.mxu2 %vm1975_vm13, %v3636_v26 }
 0x480   : > { %2028 = vmatpush.bf16.msrb.mxu3 %v1955_v51 }
 0x483   : > { %2464 = vmatmul.msk.bf16.vlgmr.msrb.gmra.mxu3 %vm1975_vm13, %v3636_v26 }
 0x4e4   : > { %v1988_v58 = vpop.f32.mrf.mxu0 }
 0x4e5   : > { %v1989_v35 = vadd.f32 %v1988_v58, %v1963_v28 }
 0x4e6   : > { %v2002_v11 = vpop.f32.mrf.mxu1 }
 0x4e7   : > { %v2035_v1 = vadd.f32 %v1989_v35, %v3181_v60  ;;  %v2003_v27 = vadd.f32 %v2002_v11, %v1963_v28 }
 0x4e9   : > { %2043 = vst [vmem:[%s3792_s8] sm:$0xff] %v2035_v1  ;;  %v2036_v26 = vadd.f32 %v2003_v27, %v3184_v0 }
 0x4eb   : > { %2044 = vst [vmem:[%s3792_s8 + $0x8] sm:$0xff] %v2036_v26 }
 0x4ec   : > { %v1990_v21 = vpop.f32.mrf.mxu0 }
 0x4ed   : > { %v1991_v4 = vadd.f32 %v1990_v21, %v1968_v19 }
 0x4ee   : > { %v2004_v42 = vpop.f32.mrf.mxu1 }
 0x4ef   : > { %v2039_v20 = vadd.f32 %v1991_v4, %v3187_v8  ;;  %v2005_v16 = vadd.f32 %v2004_v42, %v1968_v19 }
 0x4f1   : > { %2047 = vst [vmem:[%s3792_s8 + $0x20] sm:$0xff] %v2039_v20  ;;  %v2040_v63 = vadd.f32 %v2005_v16, %v3190_v10 }
 0x4f3   : > { %2048 = vst [vmem:[%s3792_s8 + $0x28] sm:$0xff] %v2040_v63 }
 0x501   : > { %v2016_v60 = vpop.f32.mrf.mxu2 }
 0x502   : > { %v2017_v18 = vadd.f32 %v2016_v60, %v1963_v28 }
 0x504   : > { %v2037_v30 = vadd.f32 %v2017_v18, %v3197_v36 }
 0x506   : > { %2045 = vst [vmem:[%s3792_s8 + $0x10] sm:$0xff] %v2037_v30  ;;  %v2030_v0 = vpop.f32.mrf.mxu3 }
 0x507   : > { %v2031_v61 = vadd.f32 %v2030_v0, %v1963_v28 }
 0x509   : > { %v2038_v9 = vadd.f32 %v2031_v61, %v3200_v45  ;;  %v2018_v32 = vpop.f32.mrf.mxu2 }
 0x50a   : > { %v2019_v39 = vadd.f32 %v2018_v32, %v1968_v19 }
 0x50b   : > { %2046 = vst [vmem:[%s3792_s8 + $0x18] sm:$0xff] %v2038_v9 }
 0x50c   : > { %v2041_v8 = vadd.f32 %v2019_v39, %v3203_v46 }
 0x50e   : > { %2049 = vst [vmem:[%s3792_s8 + $0x30] sm:$0xff] %v2041_v8  ;;  %v2032_v49 = vpop.f32.mrf.mxu3 }
 0x50f   : > { %v2033_v47 = vadd.f32 %v2032_v49, %v1968_v19 }
 0x511   : > { %v2042_v10 = vadd.f32 %v2033_v47, %v3206_v40 }
 0x513   : > { %2050 = vst [vmem:[%s3792_s8 + $0x38] sm:$0xff] %v2042_v10 }
 0x514 PF: > { %s17_s18 = sadd.s32 1, %s2751_s18  }
 0x515   : > { %p14_p7 = scmp.ge.s32.totalorder %s17_s18, 4  }
 0x517   :  { %16 = sbr.rel (!%p14_p7) target bundleno = 2 (0x2), region = 79 }
 0x51c   :  { %2072 = vsyncpa [#allocation3], 1 }
 0x51d   :  { %2074 = vsyncpa [#allocation3 + $0x1], 1 }
 0x51e   :  { %2075 = vsyncpa [#allocation5], 1 }

</bundles_post_ra>
